<compile_context>
chip_gen: v7x
topology: tpu7x:2x2x1
jax: 0.10.0
libtpu: 0.0.40
codegen_flags: <defaults>
</compile_context>

<pallas_src>
import functools

import jax
import jax.numpy as jnp
from jax.experimental import pallas as pl
from jax.experimental.pallas import tpu as pltpu

LANE = 128
SUBLANE = 8


def _round_up(x, m):
    return (x + m - 1) // m * m


# ----------------------------- Pallas kernel --------------------------------

def _swapvae_kernel(x1_ref, x2_ref, e1_ref, e2_ref, lvhalf_ref,
                    ew1_ref, eb1_ref, ew2_ref, eb2_ref, ew3_ref, eb3_ref,
                    wc_ref, wmu_ref, wlv_ref, db1_ref, dw2_ref, db2_ref,
                    dw3_ref, db3_ref,
                    dist1_ref, dist2_ref, r1n_ref, r2n_ref, r1o_ref, r2o_ref,
                    *, dot_dtype):
    """Fused encoder (x1 & x2) + reparametrize + latent swap + 4x decoder.

    Reparametrized decode of z = [c, s] with s = mu + exp(logvar/2) * eps is
    decomposed as
        z @ W1 = dist @ Wc + dist @ Wmu + (exp(dist * lvhalf) * eps) @ Wlv
    where Wc / Wmu / Wlv are zero-padded so the full lane-padded encoder
    output `dist` is consumed directly (no lane-sparse slicing in-kernel).
    """
    tn = x1_ref.shape[0]

    def dot(a, b):
        return jnp.dot(a.astype(dot_dtype), b.astype(dot_dtype),
                       preferred_element_type=jnp.float32)

    # ---- Encoder on [x1; x2] stacked along rows (2*tn rows, one matmul per
    # layer, good MXU utilization). ----
    x = jnp.concatenate([x1_ref[...], x2_ref[...]], axis=0)
    h = jnp.maximum(dot(x, ew1_ref[...]) + eb1_ref[...], 0.0)
    h = jnp.maximum(dot(h, ew2_ref[...]) + eb2_ref[...], 0.0)
    dist = dot(h, ew3_ref[...]) + eb3_ref[...]          # (2*tn, enc_out_pad)
    d1 = dist[:tn]
    d2 = dist[tn:]
    dist1_ref[...] = d1
    dist2_ref[...] = d2

    # ---- Reparametrize + latent swap + decoder layer 1 (split weights). ----
    lvhalf = lvhalf_ref[...]          # 0.5 on logvar columns, 0 elsewhere
    wc = wc_ref[...]
    wmu = wmu_ref[...]
    wlv = wlv_ref[...]

    a1 = dot(d1, wc)                                                   # c1@Wc
    a2 = dot(d2, wc)                                                   # c2@Wc
    s1 = dot(d1, wmu) + dot(jnp.exp(d1 * lvhalf) * e1_ref[...], wlv)   # s1@Ws
    s2 = dot(d2, wmu) + dot(jnp.exp(d2 * lvhalf) * e2_ref[...], wlv)   # s2@Ws

    b1 = db1_ref[...]
    # Stack the four z variants along rows so decoder layers 2/3 run as two
    # big, well-utilized MXU matmuls.
    hz = jnp.concatenate([
        jnp.maximum(a2 + s1 + b1, 0.0),   # z1_new = [c2, s1]
        jnp.maximum(a1 + s2 + b1, 0.0),   # z2_new = [c1, s2]
        jnp.maximum(a1 + s1 + b1, 0.0),   # z1_ori = [c1, s1]
        jnp.maximum(a2 + s2 + b1, 0.0),   # z2_ori = [c2, s2]
    ], axis=0)                            # (4*tn, H1_pad)

    hz = jnp.maximum(dot(hz, dw2_ref[...]) + db2_ref[...], 0.0)
    y = jnp.logaddexp(dot(hz, dw3_ref[...]) + db3_ref[...], 0.0)   # softplus

    r1n_ref[...] = y[0 * tn:1 * tn]
    r2n_ref[...] = y[1 * tn:2 * tn]
    r1o_ref[...] = y[2 * tn:3 * tn]
    r2o_ref[...] = y[3 * tn:4 * tn]


# ----------------------------- pallas_call wrapper --------------------------

def _full_spec(arr):
    return pl.BlockSpec(arr.shape, lambda i: (0, 0))


def _run_swapvae(x1p, x2p, eps1, eps2, lv_half_mask, enc_params, dec_params,
                 tile_n, dot_dtype):
    n_pad, d_pad = x1p.shape
    ew1, eb1, ew2, eb2, ew3, eb3 = enc_params
    wc, wmu, wlv, db1, dw2, db2, dw3, db3 = dec_params
    enc_pad = ew3.shape[1]
    h1_pad = dw2.shape[0]
    n_tiles = n_pad // tile_n

    row_x = pl.BlockSpec((tile_n, d_pad), lambda i: (i, 0))
    row_e = pl.BlockSpec((tile_n, enc_pad), lambda i: (i, 0))

    dist_shape = jax.ShapeDtypeStruct((n_pad, enc_pad), jnp.float32)
    rec_shape = jax.ShapeDtypeStruct((n_pad, d_pad), jnp.float32)

    kernel = functools.partial(_swapvae_kernel, dot_dtype=dot_dtype)

    flops_enc = 2 * (2 * n_pad) * (ew1.shape[0] * ew1.shape[1]
                                   + ew2.shape[0] * ew2.shape[1]
                                   + ew3.shape[0] * ew3.shape[1])
    flops_dec = (2 * n_pad * 6 * enc_pad * h1_pad
                 + 2 * (4 * n_pad) * (dw2.shape[0] * dw2.shape[1]
                                      + dw3.shape[0] * dw3.shape[1]))
    trans = 2 * n_pad * enc_pad + 8 * n_pad * d_pad
    bytes_acc = 4 * (x1p.size + x2p.size + eps1.size + eps2.size
                     + lv_half_mask.size
                     + sum(int(p.size) for p in enc_params)
                     + sum(int(p.size) for p in dec_params)
                     + 2 * n_pad * enc_pad + 4 * n_pad * d_pad)

    return pl.pallas_call(
        kernel,
        out_shape=(dist_shape, dist_shape,
                   rec_shape, rec_shape, rec_shape, rec_shape),
        grid=(n_tiles,),
        in_specs=[row_x, row_x, row_e, row_e, _full_spec(lv_half_mask),
                  _full_spec(ew1), _full_spec(eb1),
                  _full_spec(ew2), _full_spec(eb2),
                  _full_spec(ew3), _full_spec(eb3),
                  _full_spec(wc), _full_spec(wmu), _full_spec(wlv),
                  _full_spec(db1), _full_spec(dw2), _full_spec(db2),
                  _full_spec(dw3), _full_spec(db3)],
        out_specs=(row_e, row_e, row_x, row_x, row_x, row_x),
        compiler_params=pltpu.CompilerParams(
            dimension_semantics=("parallel",)),
        cost_estimate=pl.CostEstimate(flops=flops_enc + flops_dec,
                                      transcendentals=trans,
                                      bytes_accessed=bytes_acc),
    )(x1p, x2p, eps1, eps2, lv_half_mask,
      ew1, eb1, ew2, eb2, ew3, eb3,
      wc, wmu, wlv, db1, dw2, db2, dw3, db3)


# ----------------------------- Parameter setup ------------------------------

def _kaiming_linear(key, in_dim, out_dim, in_pad, out_pad):
    """kaiming_normal_ (fan_in, gain sqrt(2)), zero bias; stored zero-padded
    as (in_pad, out_pad) so the kernel does x @ W + b with lane-dense tiles."""
    std = jnp.sqrt(2.0 / in_dim)
    w = jax.random.normal(key, (in_dim, out_dim), jnp.float32) * std
    w = jnp.pad(w, ((0, in_pad - in_dim), (0, out_pad - out_dim)))
    b = jnp.zeros((1, out_pad), jnp.float32)
    return w, b


def init_swapvae_params(key, input_size, hidden_dim, s_dim, l_dim):
    h0, h1 = hidden_dim
    c_dim = l_dim - s_dim
    enc_out = l_dim + s_dim
    d_pad = _round_up(input_size, LANE)
    h0_pad = _round_up(h0, LANE)
    h1_pad = _round_up(h1, LANE)
    enc_out_pad = _round_up(enc_out, LANE)

    keys = jax.random.split(key, 6)
    # encoder: in -> h0 -> h1 -> (l_dim + s_dim)
    e_w1, e_b1 = _kaiming_linear(keys[0], input_size, h0, d_pad, h0_pad)
    e_w2, e_b2 = _kaiming_linear(keys[1], h0, h1, h0_pad, h1_pad)
    e_w3, e_b3 = _kaiming_linear(keys[2], h1, enc_out, h1_pad, enc_out_pad)

    # decoder: l_dim -> h1 -> h0 -> input_size (layers_dim reversed)
    std1 = jnp.sqrt(2.0 / l_dim)
    d_w1 = jax.random.normal(keys[3], (l_dim, h1), jnp.float32) * std1
    # Split W1 so the *full padded* encoder output can be multiplied directly:
    #   z @ W1 = c @ W1[:c_dim] + s @ W1[c_dim:]
    wc = jnp.zeros((enc_out_pad, h1_pad), jnp.float32)
    wc = wc.at[:c_dim, :h1].set(d_w1[:c_dim])
    wmu = jnp.zeros((enc_out_pad, h1_pad), jnp.float32)
    wmu = wmu.at[c_dim:l_dim, :h1].set(d_w1[c_dim:])
    wlv = jnp.zeros((enc_out_pad, h1_pad), jnp.float32)
    wlv = wlv.at[l_dim:enc_out, :h1].set(d_w1[c_dim:])
    d_b1 = jnp.zeros((1, h1_pad), jnp.float32)
    d_w2, d_b2 = _kaiming_linear(keys[4], h1, h0, h1_pad, h0_pad)
    d_w3, d_b3 = _kaiming_linear(keys[5], h0, input_size, h0_pad, d_pad)

    enc = (e_w1, e_b1, e_w2, e_b2, e_w3, e_b3)
    dec = (wc, wmu, wlv, d_b1, d_w2, d_b2, d_w3, d_b3)
    return enc, dec


# ----------------------------- Forward pass ---------------------------------

def swapvae_forward(x1, x2, enc_params, dec_params, s_dim, l_dim, noise_key,
                    max_tile_n=512, dot_dtype=jnp.float32):
    """Mirrors swapVAE_neural.forward (reparametrize draws fresh N(0,1) eps).

    dot_dtype=jnp.bfloat16 enables bf16 MXU operands (f32 accumulate) on
    v6e/v7x; elementwise math stays f32 (v5e-safe).
    """
    c_dim = l_dim - s_dim
    enc_out = l_dim + s_dim
    B, T, D = x1.shape
    n = B * T
    d_pad = enc_params[0].shape[0]
    enc_out_pad = enc_params[4].shape[1]

    # Large row tiles; ragged tails handled by zero-padding rows.
    tile_n = min(max_tile_n, _round_up(n, SUBLANE))
    n_pad = _round_up(n, tile_n)

    def prep(x):
        xf = x.reshape(n, D).astype(jnp.float32)
        return jnp.pad(xf, ((0, n_pad - n), (0, d_pad - D)))

    x1p = prep(x1)
    x2p = prep(x2)

    # Fresh N(0,1) eps, placed into the logvar column band of a lane-padded
    # buffer so the fused kernel consumes it without lane-sparse slicing.
    k1, k2 = jax.random.split(noise_key)

    def eps_full(k):
        e = jax.random.normal(k, (n, s_dim), jnp.float32)
        return jnp.pad(e, ((0, n_pad - n), (l_dim, enc_out_pad - enc_out)))

    eps1_full = eps_full(k1)
    eps2_full = eps_full(k2)

    lv_half_mask = jnp.zeros((1, enc_out_pad), jnp.float32)
    lv_half_mask = lv_half_mask.at[:, l_dim:enc_out].set(0.5)

    dist1, dist2, r1n, r2n, r1o, r2o = _run_swapvae(
        x1p, x2p, eps1_full, eps2_full, lv_half_mask, enc_params, dec_params,
        tile_n, dot_dtype)

    c1 = dist1[:n, :c_dim]
    mu1 = dist1[:n, c_dim:l_dim]
    logvar1 = dist1[:n, l_dim:enc_out]
    c2 = dist2[:n, :c_dim]
    mu2 = dist2[:n, c_dim:l_dim]
    logvar2 = dist2[:n, l_dim:enc_out]

    def unpad(r):
        return r[:n, :D].reshape(B, T, D)

    return (x1, unpad(r1n), unpad(r1o), x2, unpad(r2n), unpad(r2o),
            mu1.reshape(B, T, s_dim), logvar1.reshape(B, T, s_dim),
            mu2.reshape(B, T, s_dim), logvar2.reshape(B, T, s_dim),
            c1.reshape(B, T, c_dim), c2.reshape(B, T, c_dim))


# ----------------------------- Pure-JAX reference ----------------------------

def _ref_forward(x1, x2, enc_params, dec_params, s_dim, l_dim, input_size,
                 hidden_dim, eps1, eps2):
    h0, h1 = hidden_dim
    c_dim = l_dim - s_dim
    enc_out = l_dim + s_dim
    e_w1, e_b1, e_w2, e_b2, e_w3, e_b3 = enc_params
    wc, wmu, wlv, d_b1, d_w2, d_b2, d_w3, d_b3 = dec_params

    W1e, b1e = e_w1[:input_size, :h0], e_b1[:, :h0]
    W2e, b2e = e_w2[:h0, :h1], e_b2[:, :h1]
    W3e, b3e = e_w3[:h1, :enc_out], e_b3[:, :enc_out]
    W1d = jnp.concatenate([wc[:c_dim, :h1], wmu[c_dim:l_dim, :h1]], axis=0)
    b1d = d_b1[:, :h1]
    W2d, b2d = d_w2[:h1, :h0], d_b2[:, :h0]
    W3d, b3d = d_w3[:h0, :input_size], d_b3[:, :input_size]

    def enc(x):
        h = jnp.maximum(x @ W1e + b1e, 0.0)
        h = jnp.maximum(h @ W2e + b2e, 0.0)
        return h @ W3e + b3e

    def dec(z):
        h = jnp.maximum(z @ W1d + b1d, 0.0)
        h = jnp.maximum(h @ W2d + b2d, 0.0)
        return jnp.logaddexp(h @ W3d + b3d, 0.0)

    B, T, D = x1.shape
    n = B * T
    dist1 = enc(x1.reshape(n, D))
    dist2 = enc(x2.reshape(n, D))
    c1, mu1, lv1 = dist1[:, :c_dim], dist1[:, c_dim:l_dim], dist1[:, l_dim:enc_out]
    c2, mu2, lv2 = dist2[:, :c_dim], dist2[:, c_dim:l_dim], dist2[:, l_dim:enc_out]
    s1 = mu1 + jnp.exp(lv1 / 2.0) * eps1
    s2 = mu2 + jnp.exp(lv2 / 2.0) * eps2
    x1_rec = dec(jnp.concatenate([c2, s1], -1)).reshape(B, T, D)
    x2_rec = dec(jnp.concatenate([c1, s2], -1)).reshape(B, T, D)
    x1_ori = dec(jnp.concatenate([c1, s1], -1)).reshape(B, T, D)
    x2_ori = dec(jnp.concatenate([c2, s2], -1)).reshape(B, T, D)
    return x1_rec, x2_rec, x1_ori, x2_ori, mu1, lv1, mu2, lv2, c1, c2


if __name__ == "__main__":
    # Small, module-consistent shapes.
    B, T = 2, 8                # batch, trial_length
    INPUT_SIZE = 32
    HIDDEN = [48, 40]
    S_DIM, L_DIM = 16, 32      # c_dim = 16

    root = jax.random.PRNGKey(0)
    k_param, k_x1, k_x2, k_noise = jax.random.split(root, 4)

    enc_params, dec_params = init_swapvae_params(
        k_param, INPUT_SIZE, HIDDEN, S_DIM, L_DIM)

    # Firing-rate-like positive inputs.
    x1 = jax.nn.softplus(jax.random.normal(k_x1, (B, T, INPUT_SIZE), jnp.float32))
    x2 = jax.nn.softplus(jax.random.normal(k_x2, (B, T, INPUT_SIZE), jnp.float32))

    fwd = jax.jit(functools.partial(swapvae_forward, s_dim=S_DIM, l_dim=L_DIM))
    outputs = fwd(x1, x2, enc_params, dec_params, noise_key=k_noise)
    outputs = jax.block_until_ready(outputs)

    (x1_o, x1_rec, x1_rec_ori, x2_o, x2_rec, x2_rec_ori,
     mu1, logvar1, mu2, logvar2, c1, c2) = outputs

    # Pure-JAX reference (full-precision matmuls) with identical eps draws.
    k1, k2 = jax.random.split(k_noise)
    n_rows = B * T
    eps1 = jax.random.normal(k1, (n_rows, S_DIM), jnp.float32)
    eps2 = jax.random.normal(k2, (n_rows, S_DIM), jnp.float32)
    with jax.default_matmul_precision("highest"):
        (r_x1_rec, r_x2_rec, r_x1_ori, r_x2_ori,
         r_mu1, r_lv1, r_mu2, r_lv2, r_c1, r_c2) = _ref_forward(
             x1, x2, enc_params, dec_params, S_DIM, L_DIM, INPUT_SIZE,
             HIDDEN, eps1, eps2)

    def close(a, b):
        return jnp.allclose(a, b.reshape(a.shape), atol=1e-3, rtol=1e-3)

    assert close(x1_rec, r_x1_rec) and close(x2_rec, r_x2_rec)
    assert close(x1_rec_ori, r_x1_ori) and close(x2_rec_ori, r_x2_ori)
    assert close(mu1, r_mu1) and close(logvar1, r_lv1)
    assert close(mu2, r_mu2) and close(logvar2, r_lv2)
    assert close(c1, r_c1) and close(c2, r_c2)

    # Shape checks mirroring the PyTorch return signature.
    assert x1_rec.shape == x1.shape and x2_rec_ori.shape == x2.shape
    assert mu1.shape == (B, T, S_DIM) and c1.shape == (B, T, L_DIM - S_DIM)

    print("KERNEL_OK")
</pallas_src>

<mosaic_0001>
module attributes {stable_mosaic.version = 11 : i64} {
  func.func @_swapvae_kernel(%arg0: i32, %arg1: memref<16x128xf32, #tpu.memory_space<vmem>>, %arg2: memref<16x128xf32, #tpu.memory_space<vmem>>, %arg3: memref<16x128xf32, #tpu.memory_space<vmem>>, %arg4: memref<16x128xf32, #tpu.memory_space<vmem>>, %arg5: memref<1x128xf32, #tpu.memory_space<vmem>>, %arg6: memref<128x128xf32, #tpu.memory_space<vmem>>, %arg7: memref<1x128xf32, #tpu.memory_space<vmem>>, %arg8: memref<128x128xf32, #tpu.memory_space<vmem>>, %arg9: memref<1x128xf32, #tpu.memory_space<vmem>>, %arg10: memref<128x128xf32, #tpu.memory_space<vmem>>, %arg11: memref<1x128xf32, #tpu.memory_space<vmem>>, %arg12: memref<128x128xf32, #tpu.memory_space<vmem>>, %arg13: memref<128x128xf32, #tpu.memory_space<vmem>>, %arg14: memref<128x128xf32, #tpu.memory_space<vmem>>, %arg15: memref<1x128xf32, #tpu.memory_space<vmem>>, %arg16: memref<128x128xf32, #tpu.memory_space<vmem>>, %arg17: memref<1x128xf32, #tpu.memory_space<vmem>>, %arg18: memref<128x128xf32, #tpu.memory_space<vmem>>, %arg19: memref<1x128xf32, #tpu.memory_space<vmem>>, %arg20: memref<16x128xf32, #tpu.memory_space<vmem>>, %arg21: memref<16x128xf32, #tpu.memory_space<vmem>>, %arg22: memref<16x128xf32, #tpu.memory_space<vmem>>, %arg23: memref<16x128xf32, #tpu.memory_space<vmem>>, %arg24: memref<16x128xf32, #tpu.memory_space<vmem>>, %arg25: memref<16x128xf32, #tpu.memory_space<vmem>>) attributes {dimension_semantics = [#tpu.dimension_semantics<parallel>], iteration_bounds = array<i64: 1>, scalar_prefetch = 0 : i64, scratch_operands = 0 : i64, tpu.core_type = #tpu.core_type<tc>, window_params = [{transform_indices = @transform_0, window_bounds = array<i64: 16, 128>}, {transform_indices = @transform_1, window_bounds = array<i64: 16, 128>}, {transform_indices = @transform_2, window_bounds = array<i64: 16, 128>}, {transform_indices = @transform_3, window_bounds = array<i64: 16, 128>}, {pipeline_mode = #tpu.pipeline_mode<synchronous>, transform_indices = @transform_4, window_bounds = array<i64: 1, 128>}, {pipeline_mode = #tpu.pipeline_mode<synchronous>, transform_indices = @transform_5, window_bounds = array<i64: 128, 128>}, {pipeline_mode = #tpu.pipeline_mode<synchronous>, transform_indices = @transform_6, window_bounds = array<i64: 1, 128>}, {pipeline_mode = #tpu.pipeline_mode<synchronous>, transform_indices = @transform_7, window_bounds = array<i64: 128, 128>}, {pipeline_mode = #tpu.pipeline_mode<synchronous>, transform_indices = @transform_8, window_bounds = array<i64: 1, 128>}, {pipeline_mode = #tpu.pipeline_mode<synchronous>, transform_indices = @transform_9, window_bounds = array<i64: 128, 128>}, {pipeline_mode = #tpu.pipeline_mode<synchronous>, transform_indices = @transform_10, window_bounds = array<i64: 1, 128>}, {pipeline_mode = #tpu.pipeline_mode<synchronous>, transform_indices = @transform_11, window_bounds = array<i64: 128, 128>}, {pipeline_mode = #tpu.pipeline_mode<synchronous>, transform_indices = @transform_12, window_bounds = array<i64: 128, 128>}, {pipeline_mode = #tpu.pipeline_mode<synchronous>, transform_indices = @transform_13, window_bounds = array<i64: 128, 128>}, {pipeline_mode = #tpu.pipeline_mode<synchronous>, transform_indices = @transform_14, window_bounds = array<i64: 1, 128>}, {pipeline_mode = #tpu.pipeline_mode<synchronous>, transform_indices = @transform_15, window_bounds = array<i64: 128, 128>}, {pipeline_mode = #tpu.pipeline_mode<synchronous>, transform_indices = @transform_16, window_bounds = array<i64: 1, 128>}, {pipeline_mode = #tpu.pipeline_mode<synchronous>, transform_indices = @transform_17, window_bounds = array<i64: 128, 128>}, {pipeline_mode = #tpu.pipeline_mode<synchronous>, transform_indices = @transform_18, window_bounds = array<i64: 1, 128>}, {transform_indices = @transform_19, window_bounds = array<i64: 16, 128>}, {transform_indices = @transform_20, window_bounds = array<i64: 16, 128>}, {transform_indices = @transform_21, window_bounds = array<i64: 16, 128>}, {transform_indices = @transform_22, window_bounds = array<i64: 16, 128>}, {transform_indices = @transform_23, window_bounds = array<i64: 16, 128>}, {transform_indices = @transform_24, window_bounds = array<i64: 16, 128>}]} {
    %c0 = arith.constant 0 : index
    %c0_0 = arith.constant 0 : index
    %0 = vector.load %arg1[%c0, %c0_0] : memref<16x128xf32, #tpu.memory_space<vmem>>, vector<16x128xf32>
    %c0_1 = arith.constant 0 : index
    %c0_2 = arith.constant 0 : index
    %1 = vector.load %arg2[%c0_1, %c0_2] : memref<16x128xf32, #tpu.memory_space<vmem>>, vector<16x128xf32>
    %2 = tpu.concatenate %0, %1 in 0 : vector<16x128xf32>, vector<16x128xf32> -> vector<32x128xf32>
    %c0_3 = arith.constant 0 : index
    %c0_4 = arith.constant 0 : index
    %3 = vector.load %arg6[%c0_3, %c0_4] : memref<128x128xf32, #tpu.memory_space<vmem>>, vector<128x128xf32>
    %cst = arith.constant dense<0.000000e+00> : vector<32x128xf32>
    %4 = tpu.matmul %2, %3, %cst {dimension_numbers = #tpu.dot_dimension_numbers<[1], [0], [0], [1], [0, 0, 1, 1], [], []>} : vector<32x128xf32>, vector<128x128xf32>, vector<32x128xf32> -> vector<32x128xf32>
    %c0_5 = arith.constant 0 : index
    %c0_6 = arith.constant 0 : index
    %5 = vector.load %arg7[%c0_5, %c0_6] : memref<1x128xf32, #tpu.memory_space<vmem>>, vector<1x128xf32>
    %6 = vector.broadcast %5 : vector<1x128xf32> to vector<32x128xf32>
    %7 = arith.addf %4, %6 : vector<32x128xf32>
    %cst_7 = arith.constant 0.000000e+00 : f32
    %8 = vector.broadcast %cst_7 : f32 to vector<32x128xf32>
    %9 = arith.maximumf %7, %8 : vector<32x128xf32>
    %c0_8 = arith.constant 0 : index
    %c0_9 = arith.constant 0 : index
    %10 = vector.load %arg8[%c0_8, %c0_9] : memref<128x128xf32, #tpu.memory_space<vmem>>, vector<128x128xf32>
    %cst_10 = arith.constant dense<0.000000e+00> : vector<32x128xf32>
    %11 = tpu.matmul %9, %10, %cst_10 {dimension_numbers = #tpu.dot_dimension_numbers<[1], [0], [0], [1], [0, 0, 1, 1], [], []>} : vector<32x128xf32>, vector<128x128xf32>, vector<32x128xf32> -> vector<32x128xf32>
    %c0_11 = arith.constant 0 : index
    %c0_12 = arith.constant 0 : index
    %12 = vector.load %arg9[%c0_11, %c0_12] : memref<1x128xf32, #tpu.memory_space<vmem>>, vector<1x128xf32>
    %13 = vector.broadcast %12 : vector<1x128xf32> to vector<32x128xf32>
    %14 = arith.addf %11, %13 : vector<32x128xf32>
    %cst_13 = arith.constant 0.000000e+00 : f32
    %15 = vector.broadcast %cst_13 : f32 to vector<32x128xf32>
    %16 = arith.maximumf %14, %15 : vector<32x128xf32>
    %c0_14 = arith.constant 0 : index
    %c0_15 = arith.constant 0 : index
    %17 = vector.load %arg10[%c0_14, %c0_15] : memref<128x128xf32, #tpu.memory_space<vmem>>, vector<128x128xf32>
    %cst_16 = arith.constant dense<0.000000e+00> : vector<32x128xf32>
    %18 = tpu.matmul %16, %17, %cst_16 {dimension_numbers = #tpu.dot_dimension_numbers<[1], [0], [0], [1], [0, 0, 1, 1], [], []>} : vector<32x128xf32>, vector<128x128xf32>, vector<32x128xf32> -> vector<32x128xf32>
    %c0_17 = arith.constant 0 : index
    %c0_18 = arith.constant 0 : index
    %19 = vector.load %arg11[%c0_17, %c0_18] : memref<1x128xf32, #tpu.memory_space<vmem>>, vector<1x128xf32>
    %20 = vector.broadcast %19 : vector<1x128xf32> to vector<32x128xf32>
    %21 = arith.addf %18, %20 : vector<32x128xf32>
    %22 = vector.extract_strided_slice %21 {offsets = [0, 0], sizes = [16, 128], strides = [1, 1]} : vector<32x128xf32> to vector<16x128xf32>
    %23 = vector.extract_strided_slice %21 {offsets = [16, 0], sizes = [16, 128], strides = [1, 1]} : vector<32x128xf32> to vector<16x128xf32>
    %c0_19 = arith.constant 0 : index
    %c0_20 = arith.constant 0 : index
    %24 = vector.load %arg20[%c0_19, %c0_20] : memref<16x128xf32, #tpu.memory_space<vmem>>, vector<16x128xf32>
    tpu.vector_store %arg20[%c0_19, %c0_20], %22 {strides = array<i32>} : memref<16x128xf32, #tpu.memory_space<vmem>>, vector<16x128xf32>,
    %c0_21 = arith.constant 0 : index
    %c0_22 = arith.constant 0 : index
    %25 = vector.load %arg21[%c0_21, %c0_22] : memref<16x128xf32, #tpu.memory_space<vmem>>, vector<16x128xf32>
    tpu.vector_store %arg21[%c0_21, %c0_22], %23 {strides = array<i32>} : memref<16x128xf32, #tpu.memory_space<vmem>>, vector<16x128xf32>,
    %c0_23 = arith.constant 0 : index
    %c0_24 = arith.constant 0 : index
    %26 = vector.load %arg5[%c0_23, %c0_24] : memref<1x128xf32, #tpu.memory_space<vmem>>, vector<1x128xf32>
    %c0_25 = arith.constant 0 : index
    %c0_26 = arith.constant 0 : index
    %27 = vector.load %arg12[%c0_25, %c0_26] : memref<128x128xf32, #tpu.memory_space<vmem>>, vector<128x128xf32>
    %c0_27 = arith.constant 0 : index
    %c0_28 = arith.constant 0 : index
    %28 = vector.load %arg13[%c0_27, %c0_28] : memref<128x128xf32, #tpu.memory_space<vmem>>, vector<128x128xf32>
    %c0_29 = arith.constant 0 : index
    %c0_30 = arith.constant 0 : index
    %29 = vector.load %arg14[%c0_29, %c0_30] : memref<128x128xf32, #tpu.memory_space<vmem>>, vector<128x128xf32>
    %cst_31 = arith.constant dense<0.000000e+00> : vector<16x128xf32>
    %30 = tpu.matmul %22, %27, %cst_31 {dimension_numbers = #tpu.dot_dimension_numbers<[1], [0], [0], [1], [0, 0, 1, 1], [], []>} : vector<16x128xf32>, vector<128x128xf32>, vector<16x128xf32> -> vector<16x128xf32>
    %cst_32 = arith.constant dense<0.000000e+00> : vector<16x128xf32>
    %31 = tpu.matmul %23, %27, %cst_32 {dimension_numbers = #tpu.dot_dimension_numbers<[1], [0], [0], [1], [0, 0, 1, 1], [], []>} : vector<16x128xf32>, vector<128x128xf32>, vector<16x128xf32> -> vector<16x128xf32>
    %cst_33 = arith.constant dense<0.000000e+00> : vector<16x128xf32>
    %32 = tpu.matmul %22, %28, %cst_33 {dimension_numbers = #tpu.dot_dimension_numbers<[1], [0], [0], [1], [0, 0, 1, 1], [], []>} : vector<16x128xf32>, vector<128x128xf32>, vector<16x128xf32> -> vector<16x128xf32>
    %33 = vector.broadcast %26 : vector<1x128xf32> to vector<16x128xf32>
    %34 = arith.mulf %22, %33 : vector<16x128xf32>
    %35 = math.exp %34 : vector<16x128xf32>
    %c0_34 = arith.constant 0 : index
    %c0_35 = arith.constant 0 : index
    %36 = vector.load %arg3[%c0_34, %c0_35] : memref<16x128xf32, #tpu.memory_space<vmem>>, vector<16x128xf32>
    %37 = arith.mulf %35, %36 : vector<16x128xf32>
    %cst_36 = arith.constant dense<0.000000e+00> : vector<16x128xf32>
    %38 = tpu.matmul %37, %29, %cst_36 {dimension_numbers = #tpu.dot_dimension_numbers<[1], [0], [0], [1], [0, 0, 1, 1], [], []>} : vector<16x128xf32>, vector<128x128xf32>, vector<16x128xf32> -> vector<16x128xf32>
    %39 = arith.addf %32, %38 : vector<16x128xf32>
    %cst_37 = arith.constant dense<0.000000e+00> : vector<16x128xf32>
    %40 = tpu.matmul %23, %28, %cst_37 {dimension_numbers = #tpu.dot_dimension_numbers<[1], [0], [0], [1], [0, 0, 1, 1], [], []>} : vector<16x128xf32>, vector<128x128xf32>, vector<16x128xf32> -> vector<16x128xf32>
    %41 = vector.broadcast %26 : vector<1x128xf32> to vector<16x128xf32>
    %42 = arith.mulf %23, %41 : vector<16x128xf32>
    %43 = math.exp %42 : vector<16x128xf32>
    %c0_38 = arith.constant 0 : index
    %c0_39 = arith.constant 0 : index
    %44 = vector.load %arg4[%c0_38, %c0_39] : memref<16x128xf32, #tpu.memory_space<vmem>>, vector<16x128xf32>
    %45 = arith.mulf %43, %44 : vector<16x128xf32>
    %cst_40 = arith.constant dense<0.000000e+00> : vector<16x128xf32>
    %46 = tpu.matmul %45, %29, %cst_40 {dimension_numbers = #tpu.dot_dimension_numbers<[1], [0], [0], [1], [0, 0, 1, 1], [], []>} : vector<16x128xf32>, vector<128x128xf32>, vector<16x128xf32> -> vector<16x128xf32>
    %47 = arith.addf %40, %46 : vector<16x128xf32>
    %c0_41 = arith.constant 0 : index
    %c0_42 = arith.constant 0 : index
    %48 = vector.load %arg15[%c0_41, %c0_42] : memref<1x128xf32, #tpu.memory_space<vmem>>, vector<1x128xf32>
    %49 = arith.addf %31, %39 : vector<16x128xf32>
    %50 = vector.broadcast %48 : vector<1x128xf32> to vector<16x128xf32>
    %51 = arith.addf %49, %50 : vector<16x128xf32>
    %cst_43 = arith.constant 0.000000e+00 : f32
    %52 = vector.broadcast %cst_43 : f32 to vector<16x128xf32>
    %53 = arith.maximumf %51, %52 : vector<16x128xf32>
    %54 = arith.addf %30, %47 : vector<16x128xf32>
    %55 = vector.broadcast %48 : vector<1x128xf32> to vector<16x128xf32>
    %56 = arith.addf %54, %55 : vector<16x128xf32>
    %cst_44 = arith.constant 0.000000e+00 : f32
    %57 = vector.broadcast %cst_44 : f32 to vector<16x128xf32>
    %58 = arith.maximumf %56, %57 : vector<16x128xf32>
    %59 = arith.addf %30, %39 : vector<16x128xf32>
    %60 = vector.broadcast %48 : vector<1x128xf32> to vector<16x128xf32>
    %61 = arith.addf %59, %60 : vector<16x128xf32>
    %cst_45 = arith.constant 0.000000e+00 : f32
    %62 = vector.broadcast %cst_45 : f32 to vector<16x128xf32>
    %63 = arith.maximumf %61, %62 : vector<16x128xf32>
    %64 = arith.addf %31, %47 : vector<16x128xf32>
    %65 = vector.broadcast %48 : vector<1x128xf32> to vector<16x128xf32>
    %66 = arith.addf %64, %65 : vector<16x128xf32>
    %cst_46 = arith.constant 0.000000e+00 : f32
    %67 = vector.broadcast %cst_46 : f32 to vector<16x128xf32>
    %68 = arith.maximumf %66, %67 : vector<16x128xf32>
    %69 = tpu.concatenate %53, %58, %63, %68 in 0 : vector<16x128xf32>, vector<16x128xf32>, vector<16x128xf32>, vector<16x128xf32> -> vector<64x128xf32>
    %c0_47 = arith.constant 0 : index
    %c0_48 = arith.constant 0 : index
    %70 = vector.load %arg16[%c0_47, %c0_48] : memref<128x128xf32, #tpu.memory_space<vmem>>, vector<128x128xf32>
    %cst_49 = arith.constant dense<0.000000e+00> : vector<64x128xf32>
    %71 = tpu.matmul %69, %70, %cst_49 {dimension_numbers = #tpu.dot_dimension_numbers<[1], [0], [0], [1], [0, 0, 1, 1], [], []>} : vector<64x128xf32>, vector<128x128xf32>, vector<64x128xf32> -> vector<64x128xf32>
    %c0_50 = arith.constant 0 : index
    %c0_51 = arith.constant 0 : index
    %72 = vector.load %arg17[%c0_50, %c0_51] : memref<1x128xf32, #tpu.memory_space<vmem>>, vector<1x128xf32>
    %73 = vector.broadcast %72 : vector<1x128xf32> to vector<64x128xf32>
    %74 = arith.addf %71, %73 : vector<64x128xf32>
    %cst_52 = arith.constant 0.000000e+00 : f32
    %75 = vector.broadcast %cst_52 : f32 to vector<64x128xf32>
    %76 = arith.maximumf %74, %75 : vector<64x128xf32>
    %c0_53 = arith.constant 0 : index
    %c0_54 = arith.constant 0 : index
    %77 = vector.load %arg18[%c0_53, %c0_54] : memref<128x128xf32, #tpu.memory_space<vmem>>, vector<128x128xf32>
    %cst_55 = arith.constant dense<0.000000e+00> : vector<64x128xf32>
    %78 = tpu.matmul %76, %77, %cst_55 {dimension_numbers = #tpu.dot_dimension_numbers<[1], [0], [0], [1], [0, 0, 1, 1], [], []>} : vector<64x128xf32>, vector<128x128xf32>, vector<64x128xf32> -> vector<64x128xf32>
    %c0_56 = arith.constant 0 : index
    %c0_57 = arith.constant 0 : index
    %79 = vector.load %arg19[%c0_56, %c0_57] : memref<1x128xf32, #tpu.memory_space<vmem>>, vector<1x128xf32>
    %80 = vector.broadcast %79 : vector<1x128xf32> to vector<64x128xf32>
    %81 = arith.addf %78, %80 : vector<64x128xf32>
    %cst_58 = arith.constant 0.000000e+00 : f32
    %82 = vector.broadcast %cst_58 : f32 to vector<64x128xf32>
    %83 = arith.maximumf %81, %82 : vector<64x128xf32>
    %84 = vector.broadcast %cst_58 : f32 to vector<64x128xf32>
    %85 = arith.subf %81, %84 : vector<64x128xf32>
    %86 = arith.cmpf one, %85, %85 : vector<64x128xf32>
    %87 = vector.broadcast %cst_58 : f32 to vector<64x128xf32>
    %88 = arith.addf %81, %87 : vector<64x128xf32>
    %89 = math.absf %85 : vector<64x128xf32>
    %cst_59 = arith.constant 0.000000e+00 : f32
    %90 = vector.broadcast %cst_59 : f32 to vector<64x128xf32>
    %91 = arith.subf %90, %89 : vector<64x128xf32>
    %92 = math.exp %91 : vector<64x128xf32>
    %93 = math.log1p %92 : vector<64x128xf32>
    %94 = arith.addf %83, %93 : vector<64x128xf32>
    %95 = arith.select %86, %88, %94 : vector<64x128xi1>, vector<64x128xf32>
    %96 = vector.extract_strided_slice %95 {offsets = [0, 0], sizes = [16, 128], strides = [1, 1]} : vector<64x128xf32> to vector<16x128xf32>
    %c0_60 = arith.constant 0 : index
    %c0_61 = arith.constant 0 : index
    %97 = vector.load %arg22[%c0_60, %c0_61] : memref<16x128xf32, #tpu.memory_space<vmem>>, vector<16x128xf32>
    tpu.vector_store %arg22[%c0_60, %c0_61], %96 {strides = array<i32>} : memref<16x128xf32, #tpu.memory_space<vmem>>, vector<16x128xf32>,
    %98 = vector.extract_strided_slice %95 {offsets = [16, 0], sizes = [16, 128], strides = [1, 1]} : vector<64x128xf32> to vector<16x128xf32>
    %c0_62 = arith.constant 0 : index
    %c0_63 = arith.constant 0 : index
    %99 = vector.load %arg23[%c0_62, %c0_63] : memref<16x128xf32, #tpu.memory_space<vmem>>, vector<16x128xf32>
    tpu.vector_store %arg23[%c0_62, %c0_63], %98 {strides = array<i32>} : memref<16x128xf32, #tpu.memory_space<vmem>>, vector<16x128xf32>,
    %100 = vector.extract_strided_slice %95 {offsets = [32, 0], sizes = [16, 128], strides = [1, 1]} : vector<64x128xf32> to vector<16x128xf32>
    %c0_64 = arith.constant 0 : index
    %c0_65 = arith.constant 0 : index
    %101 = vector.load %arg24[%c0_64, %c0_65] : memref<16x128xf32, #tpu.memory_space<vmem>>, vector<16x128xf32>
    tpu.vector_store %arg24[%c0_64, %c0_65], %100 {strides = array<i32>} : memref<16x128xf32, #tpu.memory_space<vmem>>, vector<16x128xf32>,
    %102 = vector.extract_strided_slice %95 {offsets = [48, 0], sizes = [16, 128], strides = [1, 1]} : vector<64x128xf32> to vector<16x128xf32>
    %c0_66 = arith.constant 0 : index
    %c0_67 = arith.constant 0 : index
    %103 = vector.load %arg25[%c0_66, %c0_67] : memref<16x128xf32, #tpu.memory_space<vmem>>, vector<16x128xf32>
    tpu.vector_store %arg25[%c0_66, %c0_67], %102 {strides = array<i32>} : memref<16x128xf32, #tpu.memory_space<vmem>>, vector<16x128xf32>,
    return
  }
  func.func @transform_0(%arg0: i32) -> (i32, i32) {
    %c0_i32 = arith.constant 0 : i32
    %c0_i32_0 = arith.constant 0 : i32
    return %arg0, %c0_i32 : i32, i32
  }
  func.func @transform_1(%arg0: i32) -> (i32, i32) {
    %c0_i32 = arith.constant 0 : i32
    %c0_i32_0 = arith.constant 0 : i32
    return %arg0, %c0_i32 : i32, i32
  }
  func.func @transform_2(%arg0: i32) -> (i32, i32) {
    %c0_i32 = arith.constant 0 : i32
    %c0_i32_0 = arith.constant 0 : i32
    return %arg0, %c0_i32 : i32, i32
  }
  func.func @transform_3(%arg0: i32) -> (i32, i32) {
    %c0_i32 = arith.constant 0 : i32
    %c0_i32_0 = arith.constant 0 : i32
    return %arg0, %c0_i32 : i32, i32
  }
  func.func @transform_4(%arg0: i32) -> (i32, i32) {
    %c0_i32 = arith.constant 0 : i32
    %c0_i32_0 = arith.constant 0 : i32
    %c0_i32_1 = arith.constant 0 : i32
    return %c0_i32, %c0_i32_0 : i32, i32
  }
  func.func @transform_5(%arg0: i32) -> (i32, i32) {
    %c0_i32 = arith.constant 0 : i32
    %c0_i32_0 = arith.constant 0 : i32
    %c0_i32_1 = arith.constant 0 : i32
    return %c0_i32, %c0_i32_0 : i32, i32
  }
  func.func @transform_6(%arg0: i32) -> (i32, i32) {
    %c0_i32 = arith.constant 0 : i32
    %c0_i32_0 = arith.constant 0 : i32
    %c0_i32_1 = arith.constant 0 : i32
    return %c0_i32, %c0_i32_0 : i32, i32
  }
  func.func @transform_7(%arg0: i32) -> (i32, i32) {
    %c0_i32 = arith.constant 0 : i32
    %c0_i32_0 = arith.constant 0 : i32
    %c0_i32_1 = arith.constant 0 : i32
    return %c0_i32, %c0_i32_0 : i32, i32
  }
  func.func @transform_8(%arg0: i32) -> (i32, i32) {
    %c0_i32 = arith.constant 0 : i32
    %c0_i32_0 = arith.constant 0 : i32
    %c0_i32_1 = arith.constant 0 : i32
    return %c0_i32, %c0_i32_0 : i32, i32
  }
  func.func @transform_9(%arg0: i32) -> (i32, i32) {
    %c0_i32 = arith.constant 0 : i32
    %c0_i32_0 = arith.constant 0 : i32
    %c0_i32_1 = arith.constant 0 : i32
    return %c0_i32, %c0_i32_0 : i32, i32
  }
  func.func @transform_10(%arg0: i32) -> (i32, i32) {
    %c0_i32 = arith.constant 0 : i32
    %c0_i32_0 = arith.constant 0 : i32
    %c0_i32_1 = arith.constant 0 : i32
    return %c0_i32, %c0_i32_0 : i32, i32
  }
  func.func @transform_11(%arg0: i32) -> (i32, i32) {
    %c0_i32 = arith.constant 0 : i32
    %c0_i32_0 = arith.constant 0 : i32
    %c0_i32_1 = arith.constant 0 : i32
    return %c0_i32, %c0_i32_0 : i32, i32
  }
  func.func @transform_12(%arg0: i32) -> (i32, i32) {
    %c0_i32 = arith.constant 0 : i32
    %c0_i32_0 = arith.constant 0 : i32
    %c0_i32_1 = arith.constant 0 : i32
    return %c0_i32, %c0_i32_0 : i32, i32
  }
  func.func @transform_13(%arg0: i32) -> (i32, i32) {
    %c0_i32 = arith.constant 0 : i32
    %c0_i32_0 = arith.constant 0 : i32
    %c0_i32_1 = arith.constant 0 : i32
    return %c0_i32, %c0_i32_0 : i32, i32
  }
  func.func @transform_14(%arg0: i32) -> (i32, i32) {
    %c0_i32 = arith.constant 0 : i32
    %c0_i32_0 = arith.constant 0 : i32
    %c0_i32_1 = arith.constant 0 : i32
    return %c0_i32, %c0_i32_0 : i32, i32
  }
  func.func @transform_15(%arg0: i32) -> (i32, i32) {
    %c0_i32 = arith.constant 0 : i32
    %c0_i32_0 = arith.constant 0 : i32
    %c0_i32_1 = arith.constant 0 : i32
    return %c0_i32, %c0_i32_0 : i32, i32
  }
  func.func @transform_16(%arg0: i32) -> (i32, i32) {
    %c0_i32 = arith.constant 0 : i32
    %c0_i32_0 = arith.constant 0 : i32
    %c0_i32_1 = arith.constant 0 : i32
    return %c0_i32, %c0_i32_0 : i32, i32
  }
  func.func @transform_17(%arg0: i32) -> (i32, i32) {
    %c0_i32 = arith.constant 0 : i32
    %c0_i32_0 = arith.constant 0 : i32
    %c0_i32_1 = arith.constant 0 : i32
    return %c0_i32, %c0_i32_0 : i32, i32
  }
  func.func @transform_18(%arg0: i32) -> (i32, i32) {
    %c0_i32 = arith.constant 0 : i32
    %c0_i32_0 = arith.constant 0 : i32
    %c0_i32_1 = arith.constant 0 : i32
    return %c0_i32, %c0_i32_0 : i32, i32
  }
  func.func @transform_19(%arg0: i32) -> (i32, i32) {
    %c0_i32 = arith.constant 0 : i32
    %c0_i32_0 = arith.constant 0 : i32
    return %arg0, %c0_i32 : i32, i32
  }
  func.func @transform_20(%arg0: i32) -> (i32, i32) {
    %c0_i32 = arith.constant 0 : i32
    %c0_i32_0 = arith.constant 0 : i32
    return %arg0, %c0_i32 : i32, i32
  }
  func.func @transform_21(%arg0: i32) -> (i32, i32) {
    %c0_i32 = arith.constant 0 : i32
    %c0_i32_0 = arith.constant 0 : i32
    return %arg0, %c0_i32 : i32, i32
  }
  func.func @transform_22(%arg0: i32) -> (i32, i32) {
    %c0_i32 = arith.constant 0 : i32
    %c0_i32_0 = arith.constant 0 : i32
    return %arg0, %c0_i32 : i32, i32
  }
  func.func @transform_23(%arg0: i32) -> (i32, i32) {
    %c0_i32 = arith.constant 0 : i32
    %c0_i32_0 = arith.constant 0 : i32
    return %arg0, %c0_i32 : i32, i32
  }
  func.func @transform_24(%arg0: i32) -> (i32, i32) {
    %c0_i32 = arith.constant 0 : i32
    %c0_i32_0 = arith.constant 0 : i32
    return %arg0, %c0_i32 : i32, i32
  }
}

</mosaic_0001>

<bundles_post_ra>
// kernel: swapvae_forward.3
= control target key start
LH: loop header
LB: loop body
LE: loop exit
PB: predicated region body
PF: predicated region fallthrough
CT: control target
= control target key end

     0   :  { %s3258_s0 = inlined_call_operand.vmem [shape: f32[16,128], index: 0, kind: input, shape index: {}]   ;;  %s3259_s1 = inlined_call_operand.vmem [shape: f32[16,128], index: 1, kind: input, shape index: {}]   ;;  %s3260_s2 = inlined_call_operand.vmem [shape: f32[16,128], index: 2, kind: input, shape index: {}]   ;;  %s3261_s3 = inlined_call_operand.vmem [shape: f32[16,128], index: 3, kind: input, shape index: {}]   ;;  %s3262_s4 = inlined_call_operand.vmem [shape: f32[1,128], index: 4, kind: input, shape index: {}]   ;;  %s3263_s5 = inlined_call_operand.vmem [shape: f32[128,128], index: 5, kind: input, shape index: {}]   ;;  %s3264_s6 = inlined_call_operand.vmem [shape: f32[1,128], index: 6, kind: input, shape index: {}]   ;;  %s3265_s7 = inlined_call_operand.vmem [shape: f32[128,128], index: 7, kind: input, shape index: {}]   ;;  %s3266_s8 = inlined_call_operand.vmem [shape: f32[1,128], index: 8, kind: input, shape index: {}]   ;;  %s3267_s9 = inlined_call_operand.hbm [shape: f32[128,128], index: 9, kind: input, shape index: {}]   ;;  %s3268_s10 = inlined_call_operand.vmem [shape: f32[1,128], index: 10, kind: input, shape index: {}]   ;;  %s3269_s11 = inlined_call_operand.hbm [shape: f32[128,128], index: 11, kind: input, shape index: {}]   ;;  %s3270_s12 = inlined_call_operand.hbm [shape: f32[128,128], index: 12, kind: input, shape index: {}]   ;;  %s3271_s13 = inlined_call_operand.hbm [shape: f32[128,128], index: 13, kind: input, shape index: {}]   ;;  %s3272_s14 = inlined_call_operand.vmem [shape: f32[1,128], index: 14, kind: input, shape index: {}]   ;;  %s3273_s15 = inlined_call_operand.hbm [shape: f32[128,128], index: 15, kind: input, shape index: {}]   ;;  %s3274_s16 = inlined_call_operand.vmem [shape: f32[1,128], index: 16, kind: input, shape index: {}]   ;;  %s3275_s17 = inlined_call_operand.hbm [shape: f32[128,128], index: 17, kind: input, shape index: {}]   ;;  %s3276_s18 = inlined_call_operand.vmem [shape: f32[1,128], index: 18, kind: input, shape index: {}]   ;;  %s3277_s19 = inlined_call_operand.vmem [shape: f32[16,128], index: 19, kind: output, shape index: {0}]   ;;  %s3278_s20 = inlined_call_operand.vmem [shape: f32[16,128], index: 20, kind: output, shape index: {1}]   ;;  %s3279_s21 = inlined_call_operand.vmem [shape: f32[16,128], index: 21, kind: output, shape index: {2}]   ;;  %s3280_s22 = inlined_call_operand.vmem [shape: f32[16,128], index: 22, kind: output, shape index: {3}]   ;;  %s3281_s23 = inlined_call_operand.vmem [shape: f32[16,128], index: 23, kind: output, shape index: {4}]   ;;  %s3282_s24 = inlined_call_operand.vmem [shape: f32[16,128], index: 24, kind: output, shape index: {5}]  }
   0x1   :  { %3289 = sst [smem:[#allocation16_spill]] %s3258_s0 }
   0x2   :  { %3290 = sst [smem:[#allocation17_spill]] %s3259_s1 }
   0x3   :  { %3291 = sst [smem:[#allocation18_spill]] %s3260_s2 }
   0x4   :  { %3292 = sst [smem:[#allocation19_spill]] %s3261_s3 }
   0x5   :  { %3293 = sst [smem:[#allocation20_spill]] %s3262_s4 }
   0x6   :  { %3294 = sst [smem:[#allocation21_spill]] %s3263_s5 }
   0x7   :  { %3295 = sst [smem:[#allocation22_spill]] %s3264_s6 }
   0x8   :  { %3296 = sst [smem:[#allocation23_spill]] %s3265_s7 }
   0x9   :  { %3297 = sst [smem:[#allocation24_spill]] %s3266_s8 }
   0xa   :  { %30 = vsyncpa [#allocation3], 0 }
   0xb   :  { %31 = vsyncpa [#allocation5], 0 }
   0xc   :  { %32 = vsyncpa [#allocation8], 0 }
   0xd   :  { %33 = vsyncpa [#allocation11], 0  ;;  %s2685_s5 = smov [#allocation4]   ;;  %s2686_s27 = smov [#allocation7]  }
   0xe   :  { %s71_s26 = sshll.u32 %s2685_s5, 4  ;;  %s95_s28 = sshll.u32 %s2686_s27, 4  ;;  %s72_s26 = int_to_ptr.vmem [resolvable:$true] %s71_s26  ;;  %s2818_s28 = int_to_ptr.vmem [resolvable:$true] %s95_s28 }
   0xf   :  { %s2545_s29 = scalar_lea.hbm %s3269_s11, 2048 }
  0x10   :  { %p2546_p0 = scmp.ne.s32.totalorder %s3269_s11, %s2545_s29  ;;  %p2549_p1 = scmp.lt.u32.totalorder %s2545_s29, %s3269_s11 }
  0x12   :  { %p2551_p2 = pnand %p2549_p1, %p2546_p0 }
  0x14   :  { %2554 = shalt.err (!%p2551_p2)
}
  0x15   :  { %s2555_s25 = scalar_lea.vmem %s72_s26, 2048  ;;  %p2560_p4 = scmp.lt.s32.totalorder %s72_s26, %s72_s26 }
  0x16   :  { %p2556_p3 = scmp.ne.s32.totalorder %s72_s26, %s2555_s25  ;;  %p2561_p5 = scmp.lt.s32.totalorder %s2555_s25, %s2555_s25 }
  0x18   :  { %p2562_p6 = por %p2561_p5, %p2560_p4 }
  0x1a   :  { %p2563_p7 = pnand %p2562_p6, %p2556_p3 }
  0x1c   :  { %2566 = shalt.err (!%p2563_p7)
}
  0x1d   :  { %s2687_s8 = smov 128   ;;  %s2688_s4 = smov 8  }
  0x1e   :  { %77 = dma.hbm_to_vmem [thread:$0]  %s3269_s11, 2048, %s72_s26, [#allocation5], %s2687_s8, %s2687_s8, %s2688_s4  }
  0x1f   :  { %s2567_s2 = scalar_lea.hbm %s3271_s13, 2048 }
  0x20   :  { %p2568_p8 = scmp.ne.s32.totalorder %s3271_s13, %s2567_s2  ;;  %p2571_p9 = scmp.lt.u32.totalorder %s2567_s2, %s3271_s13 }
  0x22   :  { %p2573_p10 = pnand %p2571_p9, %p2568_p8 }
  0x24   :  { %2576 = shalt.err (!%p2573_p10)
}
  0x25   :  { %s2577_s3 = scalar_lea.vmem %s2818_s28, 2048  ;;  %p2582_p12 = scmp.lt.s32.totalorder %s2818_s28, %s2818_s28 }
  0x26   :  { %p2578_p11 = scmp.ne.s32.totalorder %s2818_s28, %s2577_s3  ;;  %p2583_p13 = scmp.lt.s32.totalorder %s2577_s3, %s2577_s3 }
  0x28   :  { %p2584_p0 = por %p2583_p13, %p2582_p12 }
  0x2a   :  { %p2585_p1 = pnand %p2584_p0, %p2578_p11 }
  0x2c   :  { %2588 = shalt.err (!%p2585_p1)
}
  0x2d   :  { %101 = dma.hbm_to_vmem [thread:$0]  %s3271_s13, 2048, %s2818_s28, [#allocation8], %s2687_s8, %s2687_s8, %s2688_s4  }
  0x2e   :  { %s2689_s25 = smov [#allocation2]   ;;  %s2690_s5 = smov [#allocation6]  }
  0x2f   :  { %s57_s1 = sshll.u32 %s2689_s25, 4  ;;  %s83_s27 = sshll.u32 %s2690_s5, 4  ;;  %s58_s1 = int_to_ptr.vmem [resolvable:$true] %s57_s1  ;;  %s2855_s27 = int_to_ptr.vmem [resolvable:$true] %s83_s27 }
  0x30   :  { %s2589_s29 = scalar_lea.hbm %s3267_s9, 2048 }
  0x31   :  { %p2590_p2 = scmp.ne.s32.totalorder %s3267_s9, %s2589_s29  ;;  %p2593_p3 = scmp.lt.u32.totalorder %s2589_s29, %s3267_s9 }
  0x33   :  { %p2595_p4 = pnand %p2593_p3, %p2590_p2 }
  0x35   :  { %2598 = shalt.err (!%p2595_p4)
}
  0x36   :  { %s2599_s13 = scalar_lea.vmem %s58_s1, 2048  ;;  %p2604_p6 = scmp.lt.s32.totalorder %s58_s1, %s58_s1 }
  0x37   :  { %p2600_p5 = scmp.ne.s32.totalorder %s58_s1, %s2599_s13  ;;  %p2605_p7 = scmp.lt.s32.totalorder %s2599_s13, %s2599_s13 }
  0x39   :  { %p2606_p8 = por %p2605_p7, %p2604_p6 }
  0x3b   :  { %p2607_p9 = pnand %p2606_p8, %p2600_p5 }
  0x3d   :  { %2610 = shalt.err (!%p2607_p9)
}
  0x3e   :  { %63 = dma.hbm_to_vmem [thread:$0]  %s3267_s9, 2048, %s58_s1, [#allocation3], %s2687_s8, %s2687_s8, %s2688_s4  }
  0x3f   :  { %s2611_s5 = scalar_lea.hbm %s3270_s12, 2048 }
  0x40   :  { %p2612_p10 = scmp.ne.s32.totalorder %s3270_s12, %s2611_s5  ;;  %p2615_p11 = scmp.lt.u32.totalorder %s2611_s5, %s3270_s12 }
  0x42   :  { %p2617_p12 = pnand %p2615_p11, %p2612_p10 }
  0x44   :  { %2620 = shalt.err (!%p2617_p12)
}
  0x45   :  { %s2621_s7 = scalar_lea.vmem %s2855_s27, 2048  ;;  %p2626_p0 = scmp.lt.s32.totalorder %s2855_s27, %s2855_s27 }
  0x46   :  { %p2622_p13 = scmp.ne.s32.totalorder %s2855_s27, %s2621_s7  ;;  %p2627_p1 = scmp.lt.s32.totalorder %s2621_s7, %s2621_s7 }
  0x48   :  { %p2628_p2 = por %p2627_p1, %p2626_p0 }
  0x4a   :  { %p2629_p3 = pnand %p2628_p2, %p2622_p13 }
  0x4c   :  { %2632 = shalt.err (!%p2629_p3)
}
  0x4d   :  { %89 = dma.hbm_to_vmem [thread:$0]  %s3270_s12, 2048, %s2855_s27, [#allocation5], %s2687_s8, %s2687_s8, %s2688_s4  }
  0x4e   :  { %s2691_s30 = smov [#allocation9]   ;;  %s2692_s13 = smov [#allocation10]  }
  0x4f   :  { %s109_s3 = sshll.u32 %s2691_s30, 4  ;;  %s123_s28 = sshll.u32 %s2692_s13, 4  ;;  %s110_s3 = int_to_ptr.vmem [resolvable:$true] %s109_s3  ;;  %s2892_s28 = int_to_ptr.vmem [resolvable:$true] %s123_s28 }
  0x50   :  { %s2633_s25 = scalar_lea.hbm %s3273_s15, 2048 }
  0x51   :  { %p2634_p4 = scmp.ne.s32.totalorder %s3273_s15, %s2633_s25  ;;  %p2637_p5 = scmp.lt.u32.totalorder %s2633_s25, %s3273_s15 }
  0x53   :  { %p2639_p6 = pnand %p2637_p5, %p2634_p4 }
  0x55   :  { %2642 = shalt.err (!%p2639_p6)
}
  0x56   :  { %s2643_s12 = scalar_lea.vmem %s110_s3, 2048  ;;  %p2648_p8 = scmp.lt.s32.totalorder %s110_s3, %s110_s3 }
  0x57   :  { %p2644_p7 = scmp.ne.s32.totalorder %s110_s3, %s2643_s12  ;;  %p2649_p9 = scmp.lt.s32.totalorder %s2643_s12, %s2643_s12 }
  0x59   :  { %p2650_p10 = por %p2649_p9, %p2648_p8 }
  0x5b   :  { %p2651_p11 = pnand %p2650_p10, %p2644_p7 }
  0x5d   :  { %2654 = shalt.err (!%p2651_p11)
}
  0x5e   :  { %115 = dma.hbm_to_vmem [thread:$0]  %s3273_s15, 2048, %s110_s3, [#allocation8], %s2687_s8, %s2687_s8, %s2688_s4  }
  0x5f   :  { %s2655_s1 = scalar_lea.hbm %s3275_s17, 2048 }
  0x60   :  { %p2656_p12 = scmp.ne.s32.totalorder %s3275_s17, %s2655_s1  ;;  %p2659_p13 = scmp.lt.u32.totalorder %s2655_s1, %s3275_s17 }
  0x62   :  { %p2661_p0 = pnand %p2659_p13, %p2656_p12 }
  0x64   :  { %2664 = shalt.err (!%p2661_p0)
}
  0x65   :  { %s2665_s25 = scalar_lea.vmem %s2892_s28, 2048  ;;  %p2670_p2 = scmp.lt.s32.totalorder %s2892_s28, %s2892_s28 }
  0x66   :  { %p2666_p1 = scmp.ne.s32.totalorder %s2892_s28, %s2665_s25  ;;  %p2671_p3 = scmp.lt.s32.totalorder %s2665_s25, %s2665_s25 }
  0x68   :  { %p2672_p4 = por %p2671_p3, %p2670_p2 }
  0x6a   :  { %p2673_p5 = pnand %p2672_p4, %p2666_p1 }
  0x6c   :  { %2676 = shalt.err (!%p2673_p5)
}
  0x6d   :  { %129 = dma.hbm_to_vmem [thread:$0]  %s3275_s17, 2048, %s2892_s28, [#allocation11], %s2687_s8, %s2687_s8, %s2688_s4  }
  0x6e   :  { %2677 = dma.done.wait [#allocation3], 2048  }
  0x6f   :  { %2678 = vsyncadd [#allocation3], 4294965248 }
  0x70   :  { %2679 = dma.done.wait [#allocation5], 4096  }
  0x71   :  { %2680 = vsyncadd [#allocation5], 4294963200 }
  0x72   :  { %2681 = dma.done.wait [#allocation8], 4096  }
  0x73   :  { %2682 = vsyncadd [#allocation8], 4294963200 }
  0x74   :  { %2683 = dma.done.wait [#allocation11], 2048  }
  0x75   :  { %2684 = vsyncadd [#allocation11], 4294965248  ;;  %s3298_s2 = sld [smem:[#allocation21_spill]]  ;;  %s3299_s13 = sld [smem:[#allocation16_spill]]  ;;  %v378_v52 = vld [vmem:[#allocation2] sm:$0xff]  ;;  %v379_v53 = vld [vmem:[#allocation2 + $0x8] sm:$0xff] }
  0x76   :  { %s3300_s6 = sld [smem:[#allocation23_spill]]  ;;  %s3301_s9 = sld [smem:[#allocation17_spill]]  ;;  %v380_v54 = vld [vmem:[#allocation2 + $0x10] sm:$0xff]  ;;  %v2189_v55 = vpack.c.bf16 %v379_v53, %v378_v52  ;;  %v381_v56 = vld [vmem:[#allocation2 + $0x18] sm:$0xff]  ;;  %v382_v58 = vld [vmem:[#allocation2 + $0x20] sm:$0xff] }
  0x77   :  { %v2193_v57 = vpack.c.bf16 %v381_v56, %v380_v54  ;;  %v383_v59 = vld [vmem:[#allocation2 + $0x28] sm:$0xff]  ;;  %v384_v61 = vld [vmem:[#allocation2 + $0x30] sm:$0xff]  ;;  %v385_v62 = vld [vmem:[#allocation2 + $0x38] sm:$0xff]  ;;  %s3302_s3 = sld [smem:[#allocation22_spill]]  ;;  %s3303_s12 = sld [smem:[#allocation24_spill]] }
  0x78   :  { %v2197_v60 = vpack.c.bf16 %v383_v59, %v382_v58  ;;  %v2201_v63 = vpack.c.bf16 %v385_v62, %v384_v61  ;;  %v505_v59 = vld [vmem:[#allocation4 + $0x70] sm:$0xff]  ;;  %v523_v62 = vld [vmem:[#allocation7] sm:$0xff]  ;;  %s3305_s26 = sld [smem:[#allocation18_spill]] }
  0x7b   :  { %v154_v0 = vld [vmem:[%s3298_s2] sm:$0xff]  ;;  %v155_v1 = vld [vmem:[%s3298_s2 + $0x8] sm:$0xff]  ;;  %v156_v2 = vld [vmem:[%s3298_s2 + $0x10] sm:$0xff] }
  0x7c   :  { %v2125_v3 = vpack.c.bf16 %v155_v1, %v154_v0  ;;  %v157_v4 = vld [vmem:[%s3298_s2 + $0x18] sm:$0xff]  ;;  %v158_v6 = vld [vmem:[%s3298_s2 + $0x20] sm:$0xff]  ;;  %v159_v7 = vld [vmem:[%s3298_s2 + $0x28] sm:$0xff] }
  0x7d   :  { %v2129_v5 = vpack.c.bf16 %v157_v4, %v156_v2  ;;  %v2133_v8 = vpack.c.bf16 %v159_v7, %v158_v6  ;;  %v150_v9 = vld [vmem:[%s3299_s13] sm:$0xff]  ;;  %v160_v10 = vld [vmem:[%s3298_s2 + $0x30] sm:$0xff]  ;;  %v161_v11 = vld [vmem:[%s3298_s2 + $0x38] sm:$0xff] }
  0x7e   :  { %2126 = vmatprep.subr.bf16.mxu0 %v2125_v3  ;;  %1745 = vmatprep.mubr.f32.mxu0 %v150_v9  ;;  %v266_v12 = vld [vmem:[%s3300_s6] sm:$0xff]  ;;  %v267_v13 = vld [vmem:[%s3300_s6 + $0x8] sm:$0xff]  ;;  %v268_v14 = vld [vmem:[%s3300_s6 + $0x10] sm:$0xff]  ;;  %v2137_v18 = vpack.c.bf16 %v161_v11, %v160_v10 }
  0x7f   :  { %2128 = vmatpush3.bf16.msra.mxu0 %v2125_v3  ;;  %v269_v15 = vld [vmem:[%s3300_s6 + $0x18] sm:$0xff]  ;;  %v2157_v16 = vpack.c.bf16 %v267_v13, %v266_v12  ;;  %v270_v19 = vld [vmem:[%s3300_s6 + $0x20] sm:$0xff]  ;;  %v271_v20 = vld [vmem:[%s3300_s6 + $0x28] sm:$0xff] }
  0x80   :  { %2130 = vmatprep.subr.bf16.mxu0 %v2129_v5  ;;  %v2161_v17 = vpack.c.bf16 %v269_v15, %v268_v14  ;;  %v162_v21 = vld [vmem:[%s3298_s2 + $0x40] sm:$0xff]  ;;  %v163_v22 = vld [vmem:[%s3298_s2 + $0x48] sm:$0xff]  ;;  %v2165_v23 = vpack.c.bf16 %v271_v20, %v270_v19  ;;  %v272_v25 = vld [vmem:[%s3300_s6 + $0x30] sm:$0xff] }
  0x81   :  { %2158 = vmatprep.subr.bf16.mxu1 %v2157_v16  ;;  %v2141_v24 = vpack.c.bf16 %v163_v22, %v162_v21  ;;  %v273_v26 = vld [vmem:[%s3300_s6 + $0x38] sm:$0xff]  ;;  %v164_v27 = vld [vmem:[%s3298_s2 + $0x50] sm:$0xff]  ;;  %v274_v31 = vld [vmem:[%s3300_s6 + $0x40] sm:$0xff] }
  0x82   :  { %2160 = vmatpush3.bf16.msra.mxu1 %v2157_v16  ;;  %v165_v28 = vld [vmem:[%s3298_s2 + $0x58] sm:$0xff]  ;;  %v2169_v29 = vpack.c.bf16 %v273_v26, %v272_v25  ;;  %v275_v32 = vld [vmem:[%s3300_s6 + $0x48] sm:$0xff]  ;;  %v166_v33 = vld [vmem:[%s3298_s2 + $0x60] sm:$0xff] }
  0x83   :  { %2132 = vmatpush3.bf16.msra.mxu0 %v2129_v5  ;;  %2162 = vmatprep.subr.bf16.mxu1 %v2161_v17  ;;  %v2145_v30 = vpack.c.bf16 %v165_v28, %v164_v27  ;;  %v167_v34 = vld [vmem:[%s3298_s2 + $0x68] sm:$0xff]  ;;  %v2173_v35 = vpack.c.bf16 %v275_v32, %v274_v31  ;;  %v276_v37 = vld [vmem:[%s3300_s6 + $0x50] sm:$0xff]  ;;  %v277_v38 = vld [vmem:[%s3300_s6 + $0x58] sm:$0xff] }
  0x84   :  { %2134 = vmatprep.subr.bf16.mxu0 %v2133_v8  ;;  %v2149_v36 = vpack.c.bf16 %v167_v34, %v166_v33  ;;  %v168_v39 = vld [vmem:[%s3298_s2 + $0x70] sm:$0xff]  ;;  %v169_v40 = vld [vmem:[%s3298_s2 + $0x78] sm:$0xff]  ;;  %v2177_v41 = vpack.c.bf16 %v277_v38, %v276_v37  ;;  %v278_v43 = vld [vmem:[%s3300_s6 + $0x60] sm:$0xff]  ;;  %s3304_s2 = sld [smem:[#allocation20_spill]] }
  0x85   :  { %v2153_v42 = vpack.c.bf16 %v169_v40, %v168_v39  ;;  %v279_v44 = vld [vmem:[%s3300_s6 + $0x68] sm:$0xff]  ;;  %v152_v47 = vld [vmem:[%s3301_s9] sm:$0xff]  ;;  %v280_v49 = vld [vmem:[%s3300_s6 + $0x70] sm:$0xff] }
  0x86   :  { %2164 = vmatpush3.bf16.msra.mxu1 %v2161_v17  ;;  %v2181_v45 = vpack.c.bf16 %v279_v44, %v278_v43  ;;  %v151_v46 = vld [vmem:[%s3299_s13 + $0x8] sm:$0xff]  ;;  %v281_v50 = vld [vmem:[%s3300_s6 + $0x78] sm:$0xff]  ;;  %v386_v0 = vld [vmem:[#allocation2 + $0x40] sm:$0xff]  ;;  %s3306_s13 = sld [smem:[#allocation19_spill]] }
  0x87   :  { %2136 = vmatpush3.bf16.msra.mxu0 %v2133_v8  ;;  %2166 = vmatprep.subr.bf16.mxu1 %v2165_v23  ;;  %v153_v48 = vld [vmem:[%s3301_s9 + $0x8] sm:$0xff]  ;;  %v2185_v51 = vpack.c.bf16 %v281_v50, %v280_v49  ;;  %v388_v3 = vld [vmem:[#allocation2 + $0x50] sm:$0xff]  ;;  %v389_v4 = vld [vmem:[#allocation2 + $0x58] sm:$0xff] }
  0x88   :  { %2138 = vmatprep.subr.bf16.mxu0 %v2137_v18  ;;  %v387_v1 = vld [vmem:[#allocation2 + $0x48] sm:$0xff]  ;;  %v2209_v5 = vpack.c.bf16 %v389_v4, %v388_v3  ;;  %v390_v6 = vld [vmem:[#allocation2 + $0x60] sm:$0xff]  ;;  %v392_v22 = vld [vmem:[#allocation2 + $0x70] sm:$0xff] }
  0x89   :  { %v2205_v2 = vpack.c.bf16 %v387_v1, %v386_v0  ;;  %v391_v7 = vld [vmem:[#allocation2 + $0x68] sm:$0xff]  ;;  %v1490_v9 = vld [vmem:[%s3302_s3] ss:$0 sm:$0xff]  ;;  %v493_v27 = vld [vmem:[#allocation4 + $0x10] sm:$0xff] }
  0x8a   :  { %2168 = vmatpush3.bf16.msra.mxu1 %v2165_v23  ;;  %v2213_v8 = vpack.c.bf16 %v391_v7, %v390_v6  ;;  %v393_v23 = vld [vmem:[#allocation2 + $0x78] sm:$0xff]  ;;  %v491_v25 = vld [vmem:[#allocation4] sm:$0xff]  ;;  %v492_v26 = vld [vmem:[#allocation4 + $0x8] sm:$0xff] }
  0x8b   :  { %2140 = vmatpush3.bf16.msra.mxu0 %v2137_v18  ;;  %2170 = vmatprep.subr.bf16.mxu1 %v2169_v29  ;;  %v2221_v28 = vpack.c.bf16 %v492_v26, %v491_v25  ;;  %v495_v31 = vld [vmem:[#allocation4 + $0x20] sm:$0xff]  ;;  %v496_v32 = vld [vmem:[#allocation4 + $0x28] sm:$0xff]  ;;  %v497_v34 = vld [vmem:[#allocation4 + $0x30] sm:$0xff] }
  0x8c   :  { %2142 = vmatprep.subr.bf16.mxu0 %v2141_v24  ;;  %v2229_v33 = vpack.c.bf16 %v496_v32, %v495_v31  ;;  %v499_v37 = vld [vmem:[#allocation4 + $0x40] sm:$0xff]  ;;  %v500_v38 = vld [vmem:[#allocation4 + $0x48] sm:$0xff]  ;;  %v501_v40 = vld [vmem:[#allocation4 + $0x50] sm:$0xff] }
  0x8d   :  { %v2237_v39 = vpack.c.bf16 %v500_v38, %v499_v37  ;;  %v503_v43 = vld [vmem:[#allocation4 + $0x60] sm:$0xff]  ;;  %v504_v44 = vld [vmem:[#allocation4 + $0x68] sm:$0xff]  ;;  %v525_v3 = vld [vmem:[#allocation7 + $0x10] sm:$0xff] }
  0x8e   :  { %2172 = vmatpush3.bf16.msra.mxu1 %v2169_v29  ;;  %v494_v29 = vld [vmem:[#allocation4 + $0x18] sm:$0xff]  ;;  %v1492_v1 = vld [vmem:[%s3268_s10] ss:$0 sm:$0xff]  ;;  %v532_v25 = vld [vmem:[#allocation7 + $0x48] sm:$0xff] }
  0x8f   :  { %2144 = vmatpush3.bf16.msra.mxu0 %v2141_v24  ;;  %2174 = vmatprep.subr.bf16.mxu1 %v2173_v35  ;;  %v2217_v24 = vpack.c.bf16 %v393_v23, %v392_v22  ;;  %v526_v4 = vld [vmem:[#allocation7 + $0x18] sm:$0xff]  ;;  %v1493_v6 = vld [vmem:[%s3304_s2] ss:$0 sm:$0xff]  ;;  %v536_v38 = vld [vmem:[#allocation7 + $0x68] sm:$0xff] }
  0x90   :  { %2146 = vmatprep.subr.bf16.mxu0 %v2145_v30  ;;  %v535_v37 = vld [vmem:[#allocation7 + $0x60] sm:$0xff] }
  0x92   :  { %2176 = vmatpush3.bf16.msra.mxu1 %v2173_v35  ;;  %v498_v35 = vld [vmem:[#allocation4 + $0x38] sm:$0xff] }
  0x93   :  { %2148 = vmatpush3.bf16.msra.mxu0 %v2145_v30  ;;  %2178 = vmatprep.subr.bf16.mxu1 %v2177_v41  ;;  %v2225_v30 = vpack.c.bf16 %v494_v29, %v493_v27  ;;  %v533_v29 = vld [vmem:[#allocation7 + $0x50] sm:$0xff] }
  0x94   :  { %2150 = vmatprep.subr.bf16.mxu0 %v2149_v36 }
  0x96   :  { %2180 = vmatpush3.bf16.msra.mxu1 %v2177_v41  ;;  %v502_v41 = vld [vmem:[#allocation4 + $0x58] sm:$0xff] }
  0x97   :  { %2152 = vmatpush3.bf16.msra.mxu0 %v2149_v36  ;;  %2182 = vmatprep.subr.bf16.mxu1 %v2181_v45  ;;  %v2233_v36 = vpack.c.bf16 %v498_v35, %v497_v34 }
  0x98   :  { %2154 = vmatprep.subr.bf16.mxu0 %v2153_v42 }
  0x9a   :  { %2184 = vmatpush3.bf16.msra.mxu1 %v2181_v45  ;;  %v2245_v45 = vpack.c.bf16 %v504_v44, %v503_v43  ;;  %v537_v43 = vld [vmem:[#allocation7 + $0x70] sm:$0xff]  ;;  %v538_v44 = vld [vmem:[#allocation7 + $0x78] sm:$0xff] }
  0x9b   :  { %2156 = vmatpush3.bf16.msra.mxu0 %v2153_v42  ;;  %2186 = vmatprep.subr.bf16.mxu1 %v2185_v51  ;;  %v2241_v42 = vpack.c.bf16 %v502_v41, %v501_v40 }
  0x9c   :  { %2190 = vmatprep.subr.bf16.mxu0 %v2189_v55 }
  0x9e   :  { %1746 = vmatmul.mubr.f32.vlgmr.msra.gmra.mrb[0].mxu0 %v151_v46  ;;  %2188 = vmatpush3.bf16.msra.mxu1 %v2185_v51  ;;  %v1491_v46 = vld [vmem:[%s3303_s12] ss:$0 sm:$0xff] }
  0x9f   :  { %1748 = vmatprep.mubr.f32.mxu0 %v152_v47  ;;  %2192 = vmatpush3.bf16.msra.mxu0 %v2189_v55 }
  0xa0   :  { %2194 = vmatprep.subr.bf16.mxu0 %v2193_v57  ;;  %2222 = vmatprep.subr.bf16.mxu1 %v2221_v28 }
  0xa2   :  { %1749 = vmatmul.mubr.f32.gmra.mrb[2].mxu0 %v153_v48 }
  0xa3   :  { %2196 = vmatpush3.bf16.msra.mxu0 %v2193_v57 }
  0xa4   :  { %2198 = vmatprep.subr.bf16.mxu0 %v2197_v60 }
  0xa7   :  { %2200 = vmatpush3.bf16.msra.mxu0 %v2197_v60  ;;  %v506_v60 = vld [vmem:[#allocation4 + $0x78] sm:$0xff] }
  0xa8   :  { %2202 = vmatprep.subr.bf16.mxu0 %v2201_v63  ;;  %v2249_v61 = vpack.c.bf16 %v506_v60, %v505_v59 }
  0xab   :  { %2204 = vmatpush3.bf16.msra.mxu0 %v2201_v63  ;;  %v524_v63 = vld [vmem:[#allocation7 + $0x8] sm:$0xff] }
  0xac   :  { %2206 = vmatprep.subr.bf16.mxu0 %v2205_v2  ;;  %v2285_v0 = vpack.c.bf16 %v524_v63, %v523_v62  ;;  %v514_v62 = vld [vmem:[#allocation6 + $0x38] sm:$0xff] }
  0xaf   :  { %2208 = vmatpush3.bf16.msra.mxu0 %v2205_v2 }
  0xb0   :  { %2210 = vmatprep.subr.bf16.mxu0 %v2209_v5 }
  0xb3   :  { %2212 = vmatpush3.bf16.msra.mxu0 %v2209_v5 }
  0xb4   :  { %2214 = vmatprep.subr.bf16.mxu0 %v2213_v8 }
  0xb7   :  { %2216 = vmatpush3.bf16.msra.mxu0 %v2213_v8 }
  0xb8   :  { %2218 = vmatprep.subr.bf16.mxu0 %v2217_v24 }
  0xbb   :  { %2220 = vmatpush3.bf16.msra.mxu0 %v2217_v24  ;;  %v531_v24 = vld [vmem:[#allocation7 + $0x40] sm:$0xff] }
  0xbc   :  { %2254 = vmatprep.subr.bf16.mxu0 %v2221_v28  ;;  %v2301_v27 = vpack.c.bf16 %v532_v25, %v531_v24  ;;  %v1053_v24 = vld [vmem:[#allocation9 + $0x38] sm:$0xff]  ;;  %v1054_v25 = vld [vmem:[#allocation9 + $0x40] sm:$0xff] }
 0x171   :  { %v1747_v10 = vpop.f32.mrb[0].mxu0 }
 0x172   :  { %v249_v11 = vadd.f32 %v1747_v10, %v1490_v9  ;;  %v243_v12 = vpop.f32.mrb[1].mxu0 }
 0x173   :  { %v244_v13 = vadd.f32 %v1490_v9, %v243_v12  ;;  %v527_v12 = vld [vmem:[#allocation7 + $0x20] sm:$0xff] }
 0x174   :  { %v263_v16 = vmax.f32 %v249_v11, 0.0 }
 0x175   :  { %v1750_v14 = vpop.f32.mrb[2].mxu0  ;;  %v262_v15 = vmax.f32 %v244_v13, 0.0  ;;  %v528_v13 = vld [vmem:[#allocation7 + $0x28] sm:$0xff] }
 0x176   :  { %v259_v17 = vadd.f32 %v1750_v14, %v1490_v9  ;;  %v253_v18 = vpop.f32.mrb[3].mxu0 }
 0x177   :  { %v254_v19 = vadd.f32 %v1490_v9, %v253_v18  ;;  %1783 = vmatprep.mubr.f32.mxu1 %v262_v15  ;;  %v2289_v9 = vpack.c.bf16 %v526_v4, %v525_v3  ;;  %v2293_v18 = vpack.c.bf16 %v528_v13, %v527_v12  ;;  %v517_v3 = vld [vmem:[#allocation6 + $0x50] sm:$0xff]  ;;  %v518_v4 = vld [vmem:[#allocation6 + $0x58] sm:$0xff]  ;;  %v1046_v13 = vld [vmem:[#allocation9] sm:$0xff] }
 0x178   :  { %1784 = vmatmul.mubr.f32.vlgmr.msra.gmra.mrb[0].mxu1 %v263_v16  ;;  %v265_v21 = vmax.f32 %v259_v17, 0.0 }
 0x179   :  { %v264_v20 = vmax.f32 %v254_v19, 0.0  ;;  %2224 = vmatpush3.bf16.msra.mxu1 %v2221_v28 }
 0x17a   :  { %2226 = vmatprep.subr.bf16.mxu1 %v2225_v30 }
 0x17b   :  { %1786 = vmatprep.mubr.f32.mxu1 %v264_v20  ;;  %v529_v20 = vld [vmem:[#allocation7 + $0x30] sm:$0xff] }
 0x17c   :  { %1787 = vmatmul.mubr.f32.gmra.mrb[2].mxu1 %v265_v21  ;;  %v530_v21 = vld [vmem:[#allocation7 + $0x38] sm:$0xff] }
 0x17d   :  { %2228 = vmatpush3.bf16.msra.mxu1 %v2225_v30  ;;  %v2297_v23 = vpack.c.bf16 %v530_v21, %v529_v20  ;;  %v1050_v20 = vld [vmem:[#allocation9 + $0x20] sm:$0xff]  ;;  %v1051_v21 = vld [vmem:[#allocation9 + $0x28] sm:$0xff] }
 0x17e   :  { %2230 = vmatprep.subr.bf16.mxu1 %v2229_v33 }
 0x181   :  { %2232 = vmatpush3.bf16.msra.mxu1 %v2229_v33 }
 0x182   :  { %2234 = vmatprep.subr.bf16.mxu1 %v2233_v36 }
 0x185   :  { %2236 = vmatpush3.bf16.msra.mxu1 %v2233_v36 }
 0x186   :  { %2238 = vmatprep.subr.bf16.mxu1 %v2237_v39 }
 0x189   :  { %2240 = vmatpush3.bf16.msra.mxu1 %v2237_v39 }
 0x18a   :  { %2242 = vmatprep.subr.bf16.mxu1 %v2241_v42 }
 0x18d   :  { %2244 = vmatpush3.bf16.msra.mxu1 %v2241_v42 }
 0x18e   :  { %2246 = vmatprep.subr.bf16.mxu1 %v2245_v45 }
 0x191   :  { %2248 = vmatpush3.bf16.msra.mxu1 %v2245_v45 }
 0x192   :  { %2250 = vmatprep.subr.bf16.mxu1 %v2249_v61 }
 0x195   :  { %2252 = vmatpush3.bf16.msra.mxu1 %v2249_v61 }
 0x196   :  { %2286 = vmatprep.subr.bf16.mxu1 %v2285_v0 }
 0x24b   :  { %v1785_v47 = vpop.f32.mrb[0].mxu1 }
 0x24c   :  { %v361_v48 = vadd.f32 %v1785_v47, %v1491_v46  ;;  %v355_v49 = vpop.f32.mrb[1].mxu1  ;;  %v508_v47 = vld [vmem:[#allocation6 + $0x8] sm:$0xff] }
 0x24d   :  { %v356_v50 = vadd.f32 %v1491_v46, %v355_v49 }
 0x24e   :  { %v375_v53 = vmax.f32 %v361_v48, 0.0 }
 0x24f   :  { %v374_v51 = vmax.f32 %v356_v50, 0.0  ;;  %v1788_v52 = vpop.f32.mrb[2].mxu1  ;;  %v702_v50 = vld [vmem:[%s3305_s26 + $0x8] sm:$0xff] }
 0x250   :  { %v371_v54 = vadd.f32 %v1788_v52, %v1491_v46  ;;  %v365_v55 = vpop.f32.mrb[3].mxu1  ;;  %v510_v52 = vld [vmem:[#allocation6 + $0x18] sm:$0xff] }
 0x251   :  { %v366_v56 = vadd.f32 %v1491_v46, %v365_v55  ;;  %1821 = vmatprep.mubr.f32.mxu0 %v374_v51  ;;  %v507_v46 = vld [vmem:[#allocation6] sm:$0xff]  ;;  %v509_v51 = vld [vmem:[#allocation6 + $0x10] sm:$0xff] }
 0x252   :  { %1822 = vmatmul.mubr.f32.vlgmr.msra.gmra.mrb[4].mxu0 %v375_v53  ;;  %v377_v58 = vmax.f32 %v371_v54, 0.0  ;;  %v2317_v48 = vpack.c.bf16 %v508_v47, %v507_v46  ;;  %v2321_v54 = vpack.c.bf16 %v510_v52, %v509_v51  ;;  %v1189_v46 = vld [vmem:[#allocation10 + $0x38] sm:$0xff]  ;;  %v1192_v51 = vld [vmem:[#allocation10 + $0x50] sm:$0xff] }
 0x253   :  { %v376_v57 = vmax.f32 %v366_v56, 0.0  ;;  %2256 = vmatpush3.bf16.msra.mxu0 %v2221_v28  ;;  %v701_v28 = vld [vmem:[%s3305_s26] sm:$0xff]  ;;  %v862_v56 = vld [vmem:[%s3306_s13 + $0x8] sm:$0xff]  ;;  %v1193_v52 = vld [vmem:[#allocation10 + $0x58] sm:$0xff] }
 0x254   :  { %2258 = vmatprep.subr.bf16.mxu0 %v2225_v30 }
 0x255   :  { %1824 = vmatprep.mubr.f32.mxu0 %v376_v57  ;;  %v511_v57 = vld [vmem:[#allocation6 + $0x20] sm:$0xff] }
 0x256   :  { %1825 = vmatmul.mubr.f32.gmra.mrb[6].mxu0 %v377_v58  ;;  %v512_v58 = vld [vmem:[#allocation6 + $0x28] sm:$0xff] }
 0x257   :  { %2260 = vmatpush3.bf16.msra.mxu0 %v2225_v30  ;;  %v534_v30 = vld [vmem:[#allocation7 + $0x58] sm:$0xff]  ;;  %v2325_v60 = vpack.c.bf16 %v512_v58, %v511_v57 }
 0x258   :  { %2262 = vmatprep.subr.bf16.mxu0 %v2229_v33  ;;  %v2305_v35 = vpack.c.bf16 %v534_v30, %v533_v29  ;;  %v1058_v30 = vld [vmem:[#allocation9 + $0x60] sm:$0xff] }
 0x25b   :  { %2264 = vmatpush3.bf16.msra.mxu0 %v2229_v33 }
 0x25c   :  { %2266 = vmatprep.subr.bf16.mxu0 %v2233_v36 }
 0x25f   :  { %2268 = vmatpush3.bf16.msra.mxu0 %v2233_v36  ;;  %v861_v36 = vld [vmem:[%s3306_s13] sm:$0xff] }
 0x260   :  { %2270 = vmatprep.subr.bf16.mxu0 %v2237_v39 }
 0x263   :  { %2272 = vmatpush3.bf16.msra.mxu0 %v2237_v39 }
 0x264   :  { %2274 = vmatprep.subr.bf16.mxu0 %v2241_v42 }
 0x267   :  { %2276 = vmatpush3.bf16.msra.mxu0 %v2241_v42  ;;  %v2309_v42 = vpack.c.bf16 %v536_v38, %v535_v37  ;;  %v1183_v37 = vld [vmem:[#allocation10 + $0x8] sm:$0xff]  ;;  %v1184_v38 = vld [vmem:[#allocation10 + $0x10] sm:$0xff] }
 0x268   :  { %2278 = vmatprep.subr.bf16.mxu0 %v2245_v45 }
 0x26b   :  { %2280 = vmatpush3.bf16.msra.mxu0 %v2245_v45  ;;  %v2313_v45 = vpack.c.bf16 %v538_v44, %v537_v43  ;;  %v1187_v43 = vld [vmem:[#allocation10 + $0x28] sm:$0xff] }
 0x26c   :  { %2282 = vmatprep.subr.bf16.mxu0 %v2249_v61 }
 0x26f   :  { %2284 = vmatpush3.bf16.msra.mxu0 %v2249_v61  ;;  %v513_v61 = vld [vmem:[#allocation6 + $0x30] sm:$0xff] }
 0x270   :  { %2350 = vmatprep.subr.bf16.mxu0 %v2285_v0  ;;  %v2329_v63 = vpack.c.bf16 %v514_v62, %v513_v61  ;;  %v1494_v62 = vld [vmem:[%s3272_s14] ss:$0 sm:$0xff] }
 0x325   :  { %v1823_v2 = vpop.f32.mrb[4].mxu0 }
 0x326   :  { %v3046_v5 = vadd.f32 %v1823_v2, %v1492_v1  ;;  %v467_v7 = vpop.f32.mrb[5].mxu0 }
 0x327   :  { %v3051_v8 = vadd.f32 %v1492_v1, %v467_v7  ;;  %v519_v7 = vld [vmem:[#allocation6 + $0x60] sm:$0xff] }
 0x328   :  { %487 = vst [vmem:[%s3277_s19 + $0x8] sm:$0xff] %v3046_v5  ;;  %v696_v26 = vmul.f32 %v1493_v6, %v3046_v5 }
 0x329   :  { %486 = vst [vmem:[%s3277_s19] sm:$0xff] %v3051_v8  ;;  %v695_v10 = vmul.f32 %v1493_v6, %v3051_v8  ;;  %v1826_v11 = vpop.f32.mrb[6].mxu0  ;;  %1859 = vmatprep.mubr.f32.mxu1 %v3051_v8 }
 0x32a   :  { %v3063_v14 = vadd.f32 %v1826_v11, %v1492_v1  ;;  %v477_v15 = vpop.f32.mrb[7].mxu0  ;;  %1860 = vmatmul.mubr.f32.vlgmr.msra.gmra.mrb[4].mxu1 %v3046_v5  ;;  %v699_v32 = vmul.f32 1.442695, %v696_v26  ;;  %v522_v11 = vld [vmem:[#allocation6 + $0x78] sm:$0xff]  ;;  %v1055_v26 = vld [vmem:[#allocation9 + $0x48] sm:$0xff] }
 0x32b   :  { %v697_v16 = vmul.f32 1.442695, %v695_v10  ;;  %v3066_v17 = vadd.f32 %v1492_v1, %v477_v15  ;;  %2288 = vmatpush3.bf16.msra.mxu1 %v2285_v0  ;;  %v516_v1 = vld [vmem:[#allocation6 + $0x48] sm:$0xff]  ;;  %v521_v10 = vld [vmem:[#allocation6 + $0x70] sm:$0xff] }
 0x32c   :  { %489 = vst [vmem:[%s3278_s20 + $0x8] sm:$0xff] %v3063_v14  ;;  %2290 = vmatprep.subr.bf16.mxu1 %v2289_v9  ;;  %v856_v33 = vmul.f32 %v1493_v6, %v3063_v14  ;;  %v2345_v12 = vpack.c.bf16 %v522_v11, %v521_v10  ;;  %v1047_v15 = vld [vmem:[#allocation9 + $0x8] sm:$0xff] }
 0x32d   :  { %2505 = vpow2.f32 %v697_v16  ;;  %488 = vst [vmem:[%s3278_s20] sm:$0xff] %v3066_v17  ;;  %v855_v19 = vmul.f32 %v1493_v6, %v3066_v17  ;;  %1894 = vmatprep.mubr.f32.mxu0 %v3066_v17  ;;  %v2337_v6 = vpack.c.bf16 %v518_v4, %v517_v3  ;;  %v1048_v16 = vld [vmem:[#allocation9 + $0x10] sm:$0xff] }
 0x32e   :  { %1895 = vmatmul.mubr.f32.vlgmr.msra.gmra.mrb[8].mxu0 %v3063_v14  ;;  %v859_v40 = vmul.f32 1.442695, %v856_v33  ;;  %v1060_v33 = vld [vmem:[#allocation9 + $0x70] sm:$0xff] }
 0x32f   :  { %v857_v22 = vmul.f32 1.442695, %v855_v19  ;;  %2292 = vmatpush3.bf16.msra.mxu1 %v2289_v9  ;;  %2352 = vmatpush3.bf16.msra.mxu0 %v2285_v0  ;;  %v515_v0 = vld [vmem:[#allocation6 + $0x40] sm:$0xff] }
 0x330   :  { %2294 = vmatprep.subr.bf16.mxu1 %v2293_v18  ;;  %2354 = vmatprep.subr.bf16.mxu0 %v2289_v9  ;;  %v2333_v2 = vpack.c.bf16 %v516_v1, %v515_v0 }
 0x331   :  { %2507 = vpow2.f32 %v857_v22  ;;  %v2421_v22 = vpack.c.bf16 %v1051_v21, %v1050_v20 }
 0x332   :  { %2509 = vpow2.f32 %v699_v32 }
 0x333   :  { %2296 = vmatpush3.bf16.msra.mxu1 %v2293_v18  ;;  %2356 = vmatpush3.bf16.msra.mxu0 %v2289_v9  ;;  %2511 = vpow2.f32 %v859_v40  ;;  %v1185_v40 = vld [vmem:[#allocation10 + $0x18] sm:$0xff] }
 0x334   :  { %2298 = vmatprep.subr.bf16.mxu1 %v2297_v23  ;;  %2358 = vmatprep.subr.bf16.mxu0 %v2293_v18 }
 0x337   :  { %v2506_v31 = vpop.eup %2505  ;;  %2300 = vmatpush3.bf16.msra.mxu1 %v2297_v23  ;;  %2360 = vmatpush3.bf16.msra.mxu0 %v2293_v18  ;;  %v1049_v18 = vld [vmem:[#allocation9 + $0x18] sm:$0xff] }
 0x338   :  { %2302 = vmatprep.subr.bf16.mxu1 %v2301_v27  ;;  %2362 = vmatprep.subr.bf16.mxu0 %v2297_v23  ;;  %v703_v34 = vmul.f32 %v2506_v31, %v701_v28  ;;  %v2417_v19 = vpack.c.bf16 %v1049_v18, %v1048_v16  ;;  %v1057_v28 = vld [vmem:[#allocation9 + $0x58] sm:$0xff]  ;;  %v1059_v31 = vld [vmem:[#allocation9 + $0x68] sm:$0xff] }
 0x339   :  { %v2437_v32 = vpack.c.bf16 %v1059_v31, %v1058_v30 }
 0x33a   :  { %1929 = vmatprep.mubr.f32.mxu1 %v703_v34  ;;  %v1061_v34 = vld [vmem:[#allocation9 + $0x78] sm:$0xff] }
 0x33b   :  { %v2508_v39 = vpop.eup %2507  ;;  %2304 = vmatpush3.bf16.msra.mxu1 %v2301_v27  ;;  %2364 = vmatpush3.bf16.msra.mxu0 %v2297_v23  ;;  %v1052_v23 = vld [vmem:[#allocation9 + $0x30] sm:$0xff] }
 0x33c   :  { %2306 = vmatprep.subr.bf16.mxu1 %v2305_v35  ;;  %2366 = vmatprep.subr.bf16.mxu0 %v2301_v27  ;;  %v863_v41 = vmul.f32 %v2508_v39, %v861_v36  ;;  %v2510_v49 = vpop.eup %2509  ;;  %v1182_v36 = vld [vmem:[#allocation10] sm:$0xff] }
 0x33d   :  { %v704_v53 = vmul.f32 %v2510_v49, %v702_v50  ;;  %v2512_v55 = vpop.eup %2511  ;;  %v2445_v39 = vpack.c.bf16 %v1183_v37, %v1182_v36  ;;  %v1191_v49 = vld [vmem:[#allocation10 + $0x48] sm:$0xff] }
 0x33e   :  { %1999 = vmatprep.mubr.f32.mxu0 %v863_v41  ;;  %v864_v59 = vmul.f32 %v2512_v55, %v862_v56  ;;  %v3097_v41 = vpack.c.bf16 %v1185_v40, %v1184_v38  ;;  %v1195_v55 = vld [vmem:[#allocation10 + $0x68] sm:$0xff] }
 0x33f   :  { %2308 = vmatpush3.bf16.msra.mxu1 %v2305_v35  ;;  %2368 = vmatpush3.bf16.msra.mxu0 %v2301_v27  ;;  %v1056_v27 = vld [vmem:[#allocation9 + $0x50] sm:$0xff] }
 0x340   :  { %2310 = vmatprep.subr.bf16.mxu1 %v2309_v42  ;;  %2370 = vmatprep.subr.bf16.mxu0 %v2305_v35  ;;  %v2433_v29 = vpack.c.bf16 %v1057_v28, %v1056_v27  ;;  %v1197_v27 = vld [vmem:[#allocation10 + $0x78] sm:$0xff] }
 0x343   :  { %2312 = vmatpush3.bf16.msra.mxu1 %v2309_v42  ;;  %2372 = vmatpush3.bf16.msra.mxu0 %v2305_v35  ;;  %v2441_v35 = vpack.c.bf16 %v1061_v34, %v1060_v33 }
 0x344   :  { %2314 = vmatprep.subr.bf16.mxu1 %v2313_v45  ;;  %2374 = vmatprep.subr.bf16.mxu0 %v2309_v42 }
 0x347   :  { %2316 = vmatpush3.bf16.msra.mxu1 %v2313_v45  ;;  %2376 = vmatpush3.bf16.msra.mxu0 %v2309_v42  ;;  %v1186_v42 = vld [vmem:[#allocation10 + $0x20] sm:$0xff] }
 0x348   :  { %2318 = vmatprep.subr.bf16.mxu1 %v2317_v48  ;;  %2378 = vmatprep.subr.bf16.mxu0 %v2313_v45  ;;  %v3100_v44 = vpack.c.bf16 %v1187_v43, %v1186_v42 }
 0x34a   :  { %1930 = vmatmul.mubr.f32.vlgmr.msra.gmra.mrb[6].mxu1 %v704_v53  ;;  %v2465_v53 = vpack.c.bf16 %v1193_v52, %v1192_v51 }
 0x34b   :  { %2320 = vmatpush3.bf16.msra.mxu1 %v2317_v48  ;;  %1964 = vmatprep.mubr.f32.mxu1 %v3051_v8  ;;  %v520_v8 = vld [vmem:[#allocation6 + $0x68] sm:$0xff] }
 0x34c   :  { %2380 = vmatpush3.bf16.msra.mxu0 %v2313_v45  ;;  %2322 = vmatprep.subr.bf16.mxu1 %v2321_v54  ;;  %v2341_v9 = vpack.c.bf16 %v520_v8, %v519_v7  ;;  %v1188_v45 = vld [vmem:[#allocation10 + $0x30] sm:$0xff] }
 0x34d   :  { %2382 = vmatprep.subr.bf16.mxu0 %v2317_v48  ;;  %v3104_v47 = vpack.c.bf16 %v1189_v46, %v1188_v45 }
 0x34f   :  { %2000 = vmatmul.mubr.f32.vlgmr.msra.gmra.mrb[10].mxu0 %v864_v59  ;;  %2324 = vmatpush3.bf16.msra.mxu1 %v2321_v54 }
 0x350   :  { %2384 = vmatpush3.bf16.msra.mxu0 %v2317_v48  ;;  %2034 = vmatprep.mubr.f32.mxu0 %v3066_v17  ;;  %v2413_v17 = vpack.c.bf16 %v1047_v15, %v1046_v13  ;;  %v1190_v48 = vld [vmem:[#allocation10 + $0x40] sm:$0xff] }
 0x351   :  { %2326 = vmatprep.subr.bf16.mxu1 %v2325_v60  ;;  %2386 = vmatprep.subr.bf16.mxu0 %v2321_v54  ;;  %v2461_v50 = vpack.c.bf16 %v1191_v49, %v1190_v48 }
 0x353   :  { %2328 = vmatpush3.bf16.msra.mxu1 %v2325_v60 }
 0x354   :  { %2388 = vmatpush3.bf16.msra.mxu0 %v2321_v54  ;;  %2330 = vmatprep.subr.bf16.mxu1 %v2329_v63  ;;  %v1194_v54 = vld [vmem:[#allocation10 + $0x60] sm:$0xff] }
 0x355   :  { %2390 = vmatprep.subr.bf16.mxu0 %v2325_v60  ;;  %v2469_v56 = vpack.c.bf16 %v1195_v55, %v1194_v54  ;;  %v1496_v54 = vld [vmem:[%s3276_s18] ss:$0 sm:$0xff] }
 0x357   :  { %2332 = vmatpush3.bf16.msra.mxu1 %v2329_v63 }
 0x358   :  { %2392 = vmatpush3.bf16.msra.mxu0 %v2325_v60  ;;  %2334 = vmatprep.subr.bf16.mxu1 %v2333_v2 }
 0x359   :  { %2394 = vmatprep.subr.bf16.mxu0 %v2329_v63 }
 0x35b   :  { %2336 = vmatpush3.bf16.msra.mxu1 %v2333_v2 }
 0x35c   :  { %2396 = vmatpush3.bf16.msra.mxu0 %v2329_v63  ;;  %2338 = vmatprep.subr.bf16.mxu1 %v2337_v6 }
 0x35d   :  { %2398 = vmatprep.subr.bf16.mxu0 %v2333_v2 }
 0x35f   :  { %2340 = vmatpush3.bf16.msra.mxu1 %v2337_v6 }
 0x360   :  { %2400 = vmatpush3.bf16.msra.mxu0 %v2333_v2  ;;  %2342 = vmatprep.subr.bf16.mxu1 %v2341_v9 }
 0x361   :  { %2402 = vmatprep.subr.bf16.mxu0 %v2337_v6 }
 0x363   :  { %2344 = vmatpush3.bf16.msra.mxu1 %v2341_v9 }
 0x364   :  { %2404 = vmatpush3.bf16.msra.mxu0 %v2337_v6  ;;  %2346 = vmatprep.subr.bf16.mxu1 %v2345_v12 }
 0x365   :  { %2406 = vmatprep.subr.bf16.mxu0 %v2341_v9 }
 0x367   :  { %2348 = vmatpush3.bf16.msra.mxu1 %v2345_v12 }
 0x368   :  { %2408 = vmatpush3.bf16.msra.mxu0 %v2341_v9  ;;  %2414 = vmatprep.subr.bf16.mxu1 %v2413_v17 }
 0x369   :  { %2410 = vmatprep.subr.bf16.mxu0 %v2345_v12 }
 0x36a   :  { %1965 = vmatmul.mubr.f32.vlgmr.msra.gmra.mrb[6].mxu1 %v3046_v5  ;;  %v2425_v5 = vpack.c.bf16 %v1053_v24, %v1052_v23 }
 0x36b   :  { %2416 = vmatpush3.bf16.msra.mxu1 %v2413_v17 }
 0x36c   :  { %2412 = vmatpush3.bf16.msra.mxu0 %v2345_v12  ;;  %2418 = vmatprep.subr.bf16.mxu1 %v2417_v19 }
 0x36d   :  { %2446 = vmatprep.subr.bf16.mxu0 %v2445_v39 }
 0x36f   :  { %2035 = vmatmul.mubr.f32.vlgmr.msra.gmra.mrb[10].mxu0 %v3063_v14  ;;  %2420 = vmatpush3.bf16.msra.mxu1 %v2417_v19  ;;  %v2429_v14 = vpack.c.bf16 %v1055_v26, %v1054_v25 }
 0x370   :  { %2422 = vmatprep.subr.bf16.mxu1 %v2421_v22  ;;  %2448 = vmatpush3.bf16.msra.mxu0 %v2445_v39 }
 0x371   :  { %2450 = vmatprep.subr.bf16.mxu0 %v3097_v41 }
 0x373   :  { %2424 = vmatpush3.bf16.msra.mxu1 %v2421_v22 }
 0x374   :  { %2426 = vmatprep.subr.bf16.mxu1 %v2425_v5  ;;  %2452 = vmatpush3.bf16.msra.mxu0 %v3097_v41 }
 0x375   :  { %2454 = vmatprep.subr.bf16.mxu0 %v3100_v44 }
 0x377   :  { %2428 = vmatpush3.bf16.msra.mxu1 %v2425_v5 }
 0x378   :  { %2430 = vmatprep.subr.bf16.mxu1 %v2429_v14  ;;  %2456 = vmatpush3.bf16.msra.mxu0 %v3100_v44 }
 0x379   :  { %2458 = vmatprep.subr.bf16.mxu0 %v3104_v47 }
 0x37b   :  { %2432 = vmatpush3.bf16.msra.mxu1 %v2429_v14  ;;  %v1196_v14 = vld [vmem:[#allocation10 + $0x70] sm:$0xff] }
 0x37c   :  { %2434 = vmatprep.subr.bf16.mxu1 %v2433_v29  ;;  %2460 = vmatpush3.bf16.msra.mxu0 %v3104_v47  ;;  %v2473_v28 = vpack.c.bf16 %v1197_v27, %v1196_v14 }
 0x37d   :  { %2462 = vmatprep.subr.bf16.mxu0 %v2461_v50 }
 0x37f   :  { %2436 = vmatpush3.bf16.msra.mxu1 %v2433_v29  ;;  %v1495_v29 = vld [vmem:[%s3274_s16] ss:$0 sm:$0xff] }
 0x380   :  { %2438 = vmatprep.subr.bf16.mxu1 %v2437_v32  ;;  %2464 = vmatpush3.bf16.msra.mxu0 %v2461_v50 }
 0x381   :  { %2466 = vmatprep.subr.bf16.mxu0 %v2465_v53 }
 0x383   :  { %2440 = vmatpush3.bf16.msra.mxu1 %v2437_v32 }
 0x384   :  { %2442 = vmatprep.subr.bf16.mxu1 %v2441_v35  ;;  %2468 = vmatpush3.bf16.msra.mxu0 %v2465_v53 }
 0x385   :  { %2470 = vmatprep.subr.bf16.mxu0 %v2469_v56 }
 0x387   :  { %2444 = vmatpush3.bf16.msra.mxu1 %v2441_v35 }
 0x388   :  { %2477 = vmatprep.subr.bf16.mxu1 %v2445_v39  ;;  %2472 = vmatpush3.bf16.msra.mxu0 %v2469_v56 }
 0x389   :  { %2474 = vmatprep.subr.bf16.mxu0 %v2473_v28 }
 0x38c   :  { %2476 = vmatpush3.bf16.msra.mxu0 %v2473_v28 }
 0x3fd   :  { %v1861_v57 = vpop.f32.mrb[4].mxu1 }
 0x3fe   :  { %v605_v58 = vpop.f32.mrb[5].mxu1 }
 0x401   :  { %v1896_v59 = vpop.f32.mrb[8].mxu0 }
 0x402   :  { %v680_v60 = vpop.f32.mrb[9].mxu0 }
 0x43d   :  { %v1966_v61 = vpop.f32.mrb[6].mxu1 }
 0x43e   :  { %v1017_v63 = vadd.f32 %v1966_v61, %v1896_v59  ;;  %v1035_v0 = vadd.f32 %v1966_v61, %v1861_v57  ;;  %v846_v1 = vpop.f32.mrb[7].mxu1 }
 0x43f   :  { %v1016_v2 = vadd.f32 %v846_v1, %v680_v60  ;;  %v1034_v3 = vadd.f32 %v846_v1, %v605_v58 }
 0x440   :  { %v1025_v4 = vadd.f32 %v1494_v62, %v1017_v63  ;;  %v1037_v20 = vadd.f32 %v1494_v62, %v1035_v0 }
 0x441   :  { %v1024_v6 = vadd.f32 %v1494_v62, %v1016_v2  ;;  %v1036_v17 = vadd.f32 %v1494_v62, %v1034_v3 }
 0x442   :  { %v2036_v7 = vpop.f32.mrb[10].mxu0  ;;  %v1027_v12 = vmax.f32 %v1025_v4, 0.0  ;;  %v1039_v5 = vmax.f32 %v1037_v20, 0.0 }
 0x443   :  { %v1029_v8 = vadd.f32 %v2036_v7, %v1861_v57  ;;  %v1041_v9 = vadd.f32 %v2036_v7, %v1896_v59  ;;  %v1006_v10 = vpop.f32.mrb[11].mxu0  ;;  %v1026_v11 = vmax.f32 %v1024_v6, 0.0  ;;  %v1038_v23 = vmax.f32 %v1036_v17, 0.0 }
 0x444   :  { %v1028_v13 = vadd.f32 %v1006_v10, %v605_v58  ;;  %v1040_v15 = vadd.f32 %v1006_v10, %v680_v60 }
 0x445   :  { %v1031_v16 = vadd.f32 %v1494_v62, %v1029_v8  ;;  %2069 = vmatprep.mubr.f32.mxu1 %v1026_v11  ;;  %v1043_v24 = vadd.f32 %v1494_v62, %v1041_v9 }
 0x446   :  { %v1030_v18 = vadd.f32 %v1494_v62, %v1028_v13  ;;  %2070 = vmatmul.mubr.f32.vlgmr.msra.gmra.mrb[8].mxu1 %v1027_v12  ;;  %v1042_v22 = vadd.f32 %v1494_v62, %v1040_v15 }
 0x447   :  { %2485 = vmatpush3.bf16.msra.mxu1 %v2445_v39  ;;  %v1033_v21 = vmax.f32 %v1031_v16, 0.0  ;;  %v1045_v26 = vmax.f32 %v1043_v24, 0.0 }
 0x448   :  { %v1032_v19 = vmax.f32 %v1030_v18, 0.0  ;;  %2478 = vmatprep.subr.bf16.mxu1 %v3097_v41  ;;  %v1044_v25 = vmax.f32 %v1042_v22, 0.0 }
 0x44a   :  { %2072 = vmatprep.mubr.f32.mxu1 %v1032_v19 }
 0x44b   :  { %2073 = vmatmul.mubr.f32.gmra.mrb[10].mxu1 %v1033_v21 }
 0x44c   :  { %2075 = vmatprep.mubr.f32.mxu1 %v1038_v23  ;;  %2486 = vmatpush3.bf16.msra.mxu1 %v3097_v41 }
 0x44d   :  { %2479 = vmatprep.subr.bf16.mxu1 %v3100_v44 }
 0x44f   :  { %2076 = vmatmul.mubr.f32.gmra.mrb[12].mxu1 %v1039_v5 }
 0x450   :  { %2078 = vmatprep.mubr.f32.mxu1 %v1044_v25  ;;  %2487 = vmatpush3.bf16.msra.mxu1 %v3100_v44 }
 0x451   :  { %2480 = vmatprep.subr.bf16.mxu1 %v3104_v47 }
 0x453   :  { %2079 = vmatmul.mubr.f32.gmra.mrb[14].mxu1 %v1045_v26 }
 0x454   :  { %2488 = vmatpush3.bf16.msra.mxu1 %v3104_v47 }
 0x455   :  { %2481 = vmatprep.subr.bf16.mxu1 %v2461_v50 }
 0x458   :  { %2489 = vmatpush3.bf16.msra.mxu1 %v2461_v50 }
 0x459   :  { %2482 = vmatprep.subr.bf16.mxu1 %v2465_v53 }
 0x45c   :  { %2490 = vmatpush3.bf16.msra.mxu1 %v2465_v53 }
 0x45d   :  { %2483 = vmatprep.subr.bf16.mxu1 %v2469_v56 }
 0x460   :  { %2491 = vmatpush3.bf16.msra.mxu1 %v2469_v56 }
 0x461   :  { %2484 = vmatprep.subr.bf16.mxu1 %v2473_v28 }
 0x464   :  { %2492 = vmatpush3.bf16.msra.mxu1 %v2473_v28 }
 0x519   :  { %v2071_v30 = vpop.f32.mrb[8].mxu1 }
 0x51a   :  { %v1141_v31 = vadd.f32 %v2071_v30, %v1495_v29  ;;  %v1135_v32 = vpop.f32.mrb[9].mxu1 }
 0x51b   :  { %v1136_v33 = vadd.f32 %v1495_v29, %v1135_v32 }
 0x51c   :  { %v1175_v35 = vmax.f32 %v1141_v31, 0.0 }
 0x51d   :  { %v1174_v34 = vmax.f32 %v1136_v33, 0.0 }
 0x51e   :  { %v2074_v36 = vpop.f32.mrb[10].mxu1 }
 0x51f   :  { %v1151_v37 = vadd.f32 %v2074_v36, %v1495_v29  ;;  %v1145_v38 = vpop.f32.mrb[11].mxu1  ;;  %2113 = vmatprep.mubr.f32.mxu0 %v1174_v34 }
 0x520   :  { %v1146_v39 = vadd.f32 %v1495_v29, %v1145_v38  ;;  %2114 = vmatmul.mubr.f32.vlgmr.msra.gmra.mrb[12].mxu0 %v1175_v35 }
 0x521   :  { %v1177_v42 = vmax.f32 %v1151_v37, 0.0 }
 0x522   :  { %v1176_v40 = vmax.f32 %v1146_v39, 0.0  ;;  %v2077_v41 = vpop.f32.mrb[12].mxu1 }
 0x523   :  { %v1161_v43 = vadd.f32 %v2077_v41, %v1495_v29  ;;  %v1155_v44 = vpop.f32.mrb[13].mxu1 }
 0x524   :  { %v1156_v45 = vadd.f32 %v1495_v29, %v1155_v44  ;;  %2116 = vmatprep.mubr.f32.mxu0 %v1176_v40 }
 0x525   :  { %2117 = vmatmul.mubr.f32.gmra.mrb[14].mxu0 %v1177_v42  ;;  %v1179_v48 = vmax.f32 %v1161_v43, 0.0 }
 0x526   :  { %v1178_v46 = vmax.f32 %v1156_v45, 0.0  ;;  %v2080_v47 = vpop.f32.mrb[14].mxu1 }
 0x527   :  { %v1171_v49 = vadd.f32 %v2080_v47, %v1495_v29  ;;  %v1165_v50 = vpop.f32.mrb[15].mxu1 }
 0x528   :  { %v1166_v51 = vadd.f32 %v1495_v29, %v1165_v50  ;;  %2119 = vmatprep.mubr.f32.mxu1 %v1178_v46 }
 0x529   :  { %2120 = vmatmul.mubr.f32.vlgmr.msra.gmra.mrb[16].mxu1 %v1179_v48  ;;  %v1181_v53 = vmax.f32 %v1171_v49, 0.0 }
 0x52a   :  { %v1180_v52 = vmax.f32 %v1166_v51, 0.0 }
 0x52c   :  { %2122 = vmatprep.mubr.f32.mxu1 %v1180_v52 }
 0x52d   :  { %2123 = vmatmul.mubr.f32.gmra.mrb[18].mxu1 %v1181_v53 }
 0x5f3   :  { %v2115_v55 = vpop.f32.mrb[12].mxu0 }
 0x5f4   :  { %v3124_v56 = vadd.f32 %v2115_v55, %v1496_v54  ;;  %v1271_v57 = vpop.f32.mrb[13].mxu0 }
 0x5f5   :  { %v3126_v58 = vadd.f32 %v1496_v54, %v1271_v57 }
 0x5f6   :  { %v1335_v59 = vand.u32 2147483647, %v3124_v56  ;;  %v1311_v42 = vmax.f32 %v3124_v56, 0.0  ;;  %vm1319_vm0 = vcmp.ne.f32.partialorder %v3124_v56, %v3124_v56 }
 0x5f7   :  { %v1334_v60 = vand.u32 2147483647, %v3126_v58  ;;  %v1310_v48 = vmax.f32 %v3126_v58, 0.0  ;;  %vm1318_vm1 = vcmp.ne.f32.partialorder %v3126_v58, %v3126_v58 }
 0x5f8   :  { %v1343_v61 = vsub.f32 0.0, %v1335_v59  ;;  %v2118_v62 = vpop.f32.mrb[14].mxu0 }
 0x5f9   :  { %v1342_v63 = vsub.f32 0.0, %v1334_v60  ;;  %v3130_v0 = vadd.f32 %v2118_v62, %v1496_v54  ;;  %v1281_v1 = vpop.f32.mrb[15].mxu0 }
 0x5fa   :  { %v1352_v2 = vmul.f32 1.442695, %v1343_v61  ;;  %v3132_v3 = vadd.f32 %v1496_v54, %v1281_v1 }
 0x5fb   :  { %v1350_v4 = vmul.f32 1.442695, %v1342_v63  ;;  %v1337_v6 = vand.u32 2147483647, %v3130_v0  ;;  %v1313_v52 = vmax.f32 %v3130_v0, 0.0  ;;  %vm1321_vm4 = vcmp.ne.f32.partialorder %v3130_v0, %v3130_v0 }
 0x5fc   :  { %2513 = vpow2.f32 %v1352_v2  ;;  %v1336_v7 = vand.u32 2147483647, %v3132_v3  ;;  %v2121_v8 = vpop.f32.mrb[16].mxu1  ;;  %v1312_v57 = vmax.f32 %v3132_v3, 0.0  ;;  %vm1320_vm5 = vcmp.ne.f32.partialorder %v3132_v3, %v3132_v3 }
 0x5fd   :  { %2515 = vpow2.f32 %v1350_v4  ;;  %v1345_v9 = vsub.f32 0.0, %v1337_v6  ;;  %v3136_v10 = vadd.f32 %v2121_v8, %v1496_v54  ;;  %v1291_v11 = vpop.f32.mrb[17].mxu1 }
 0x5fe   :  { %v1344_v12 = vsub.f32 0.0, %v1336_v7  ;;  %v3138_v13 = vadd.f32 %v1496_v54, %v1291_v11 }
 0x5ff   :  { %v1356_v15 = vmul.f32 1.442695, %v1345_v9  ;;  %v1339_v16 = vand.u32 2147483647, %v3136_v10  ;;  %vm1323_vm10 = vcmp.ne.f32.partialorder %v3136_v10, %v3136_v10 }
 0x600   :  { %v1354_v17 = vmul.f32 1.442695, %v1344_v12  ;;  %v1338_v18 = vand.u32 2147483647, %v3138_v13  ;;  %v2124_v19 = vpop.f32.mrb[18].mxu1  ;;  %vm1322_vm11 = vcmp.ne.f32.partialorder %v3138_v13, %v3138_v13 }
 0x601   :  { %2517 = vpow2.f32 %v1356_v15  ;;  %v1347_v20 = vsub.f32 0.0, %v1339_v16  ;;  %v3142_v21 = vadd.f32 %v2124_v19, %v1496_v54  ;;  %v1301_v22 = vpop.f32.mrb[19].mxu1 }
 0x602   :  { %2519 = vpow2.f32 %v1354_v17  ;;  %v1346_v23 = vsub.f32 0.0, %v1338_v18  ;;  %v3144_v24 = vadd.f32 %v1496_v54, %v1301_v22 }
 0x603   :  { %v1360_v5 = vmul.f32 1.442695, %v1347_v20  ;;  %v1341_v25 = vand.u32 2147483647, %v3142_v21  ;;  %vm1325_vm13 = vcmp.ne.f32.partialorder %v3142_v21, %v3142_v21 }
 0x604   :  { %v1358_v26 = vmul.f32 1.442695, %v1346_v23  ;;  %v1340_v14 = vand.u32 2147483647, %v3144_v24  ;;  %vm1324_vm15 = vcmp.ne.f32.partialorder %v3144_v24, %v3144_v24 }
 0x605   :  { %2521 = vpow2.f32 %v1360_v5  ;;  %v1349_v27 = vsub.f32 0.0, %v1341_v25 }
 0x606   :  { %v2514_v28 = vpop.eup %2513  ;;  %2523 = vpow2.f32 %v1358_v26  ;;  %v1348_v29 = vsub.f32 0.0, %v1340_v14 }
 0x607   :  { %v2516_v30 = vpop.eup %2515  ;;  %v1375_v31 = vadd.f32 1.0, %v2514_v28  ;;  %v1364_v32 = vmul.f32 1.442695, %v1349_v27  ;;  %v1378_v37 = vmul.f32 -0.5, %v2514_v28  ;;  %v1381_v45 = vand.u32 2147483647, %v2514_v28 }
 0x608   :  { %v1366_v33 = vadd.f32 1.0, %v2516_v30  ;;  %v1362_v34 = vmul.f32 1.442695, %v1348_v29  ;;  %v1369_v39 = vmul.f32 -0.5, %v2516_v30  ;;  %v1372_v50 = vand.u32 2147483647, %v2516_v30 }
 0x609   :  { %2525 = vlog2.f32 %v1375_v31  ;;  %v1379_v44 = vadd.f32 1.0, %v1378_v37  ;;  %vm1382_vm2 = vcmp.lt.f32.partialorder %v1381_v45, 0.0004427343  ;;  %v1314_v37 = vmax.f32 %v3138_v13, 0.0 }
 0x60a   :  { %2527 = vlog2.f32 %v1366_v33  ;;  %v1370_v49 = vadd.f32 1.0, %v1369_v39  ;;  %vm1373_vm3 = vcmp.lt.f32.partialorder %v1372_v50, 0.0004427343 }
 0x60b   :  { %v2518_v35 = vpop.eup %2517  ;;  %2529 = vpow2.f32 %v1364_v32  ;;  %v1380_v62 = vmul.f32 %v2514_v28, %v1379_v44 }
 0x60c   :  { %v3148_v36 = vpop.eup %2519  ;;  %v1393_v38 = vadd.f32 1.0, %v2518_v35  ;;  %2531 = vpow2.f32 %v1362_v34  ;;  %v1396_v46 = vmul.f32 -0.5, %v2518_v35  ;;  %v1399_v55 = vand.u32 2147483647, %v2518_v35 }
 0x60d   :  { %v1384_v40 = vadd.f32 1.0, %v3148_v36  ;;  %v1387_v53 = vmul.f32 -0.5, %v3148_v36  ;;  %v1390_v59 = vand.u32 2147483647, %v3148_v36  ;;  %v1371_v4 = vmul.f32 %v2516_v30, %v1370_v49 }
 0x60e   :  { %2533 = vlog2.f32 %v1393_v38  ;;  %v1397_v63 = vadd.f32 1.0, %v1396_v46  ;;  %vm3178_vm6 = vcmp.lt.f32.partialorder %v1399_v55, 0.0004427343 }
 0x60f   :  { %v3151_v41 = vpop.eup %2521  ;;  %2535 = vlog2.f32 %v1384_v40  ;;  %v1388_v8 = vadd.f32 1.0, %v1387_v53  ;;  %vm3182_vm7 = vcmp.lt.f32.partialorder %v1390_v59, 0.0004427343 }
 0x610   :  { %v3154_v43 = vpop.eup %2523  ;;  %v1411_v47 = vadd.f32 1.0, %v3151_v41  ;;  %v1414_v6 = vmul.f32 -0.5, %v3151_v41  ;;  %v1398_v22 = vmul.f32 %v2518_v35, %v1397_v63  ;;  %v1417_v23 = vand.u32 2147483647, %v3151_v41 }
 0x611   :  { %v1402_v51 = vadd.f32 1.0, %v3154_v43  ;;  %v1405_v9 = vmul.f32 -0.5, %v3154_v43  ;;  %v1389_v30 = vmul.f32 %v3148_v36, %v1388_v8  ;;  %v1408_v32 = vand.u32 2147483647, %v3154_v43 }
 0x612   :  { %2537 = vlog2.f32 %v1411_v47  ;;  %v1415_v14 = vadd.f32 1.0, %v1414_v6  ;;  %v1315_v36 = vmax.f32 %v3136_v10, 0.0  ;;  %vm1418_vm8 = vcmp.lt.f32.partialorder %v1417_v23, 0.0004427343 }
 0x613   :  { %v2526_v54 = vpop.eup %2525  ;;  %2539 = vlog2.f32 %v1402_v51  ;;  %v1406_v31 = vadd.f32 1.0, %v1405_v9  ;;  %vm1409_vm9 = vcmp.lt.f32.partialorder %v1408_v32, 0.0004427343 }
 0x614   :  { %v2528_v60 = vpop.eup %2527  ;;  %v1377_v61 = vmul.f32 0.6931472, %v2526_v54 }
 0x615   :  { %v3167_v1 = vpop.eup %2529  ;;  %v1368_v2 = vmul.f32 0.6931472, %v2528_v60  ;;  %v1407_v46 = vmul.f32 %v3154_v43, %v1406_v31 }
 0x616   :  { %v1383_v7 = vsel %vm1382_vm2, %v1380_v62, %v1377_v61  ;;  %v1429_v11 = vadd.f32 1.0, %v3167_v1  ;;  %v3176_v12 = vpop.eup %2531  ;;  %v1432_v33 = vmul.f32 -0.5, %v3167_v1  ;;  %v1435_v50 = vand.u32 2147483647, %v3167_v1 }
 0x617   :  { %v1439_v15 = vadd.f32 %v1383_v7, %v1311_v42  ;;  %v1374_v16 = vsel %vm1373_vm3, %v1371_v4, %v1368_v2  ;;  %v1420_v27 = vadd.f32 1.0, %v3176_v12  ;;  %v1416_v42 = vmul.f32 %v3151_v41, %v1415_v14 }
 0x618   :  { %v2534_v19 = vpop.eup %2533  ;;  %v1438_v20 = vadd.f32 %v1374_v16, %v1310_v48  ;;  %2541 = vlog2.f32 %v1429_v11  ;;  %v1423_v47 = vmul.f32 -0.5, %v3176_v12  ;;  %v1433_v49 = vadd.f32 1.0, %v1432_v33 }
 0x619   :  { %v2536_v5 = vpop.eup %2535  ;;  %v1447_v25 = vsel %vm1319_vm0, %v3124_v56, %v1439_v15  ;;  %v1395_v26 = vmul.f32 0.6931472, %v2534_v19  ;;  %2543 = vlog2.f32 %v1420_v27  ;;  %v1426_v59 = vand.u32 2147483647, %v3176_v12 }
 0x61a   :  { %1455 = vst [vmem:[%s3279_s21 + $0x8] sm:$0xff] %v1447_v25  ;;  %v1446_v28 = vsel %vm1318_vm1, %v3126_v58, %v1438_v20  ;;  %v1386_v29 = vmul.f32 0.6931472, %v2536_v5  ;;  %vm1436_vm12 = vcmp.lt.f32.partialorder %v1435_v50, 0.0004427343 }
 0x61b   :  { %1454 = vst [vmem:[%s3279_s21] sm:$0xff] %v1446_v28  ;;  %v1401_v56 = vsel %vm3178_vm6, %v1398_v22, %v1395_v26  ;;  %vm1427_vm14 = vcmp.lt.f32.partialorder %v1426_v59, 0.0004427343 }
 0x61c   :  { %v2538_v34 = vpop.eup %2537  ;;  %v1441_v35 = vadd.f32 %v1401_v56, %v1313_v52  ;;  %v1392_v58 = vsel %vm3182_vm7, %v1389_v30, %v1386_v29 }
 0x61d   :  { %v2540_v38 = vpop.eup %2539  ;;  %v1440_v39 = vadd.f32 %v1392_v58, %v1312_v57  ;;  %v1413_v40 = vmul.f32 0.6931472, %v2538_v34  ;;  %v1434_v57 = vmul.f32 %v3167_v1, %v1433_v49 }
 0x61e   :  { %v1449_v44 = vsel %vm1321_vm4, %v3130_v0, %v1441_v35  ;;  %v1404_v45 = vmul.f32 0.6931472, %v2540_v38 }
 0x61f   :  { %1457 = vst [vmem:[%s3280_s22 + $0x8] sm:$0xff] %v1449_v44  ;;  %v1448_v41 = vsel %vm1320_vm5, %v3132_v3, %v1440_v39  ;;  %v1419_v48 = vsel %vm1418_vm8, %v1416_v42, %v1413_v40  ;;  %v1424_v3 = vadd.f32 1.0, %v1423_v47 }
 0x620   :  { %1456 = vst [vmem:[%s3280_s22] sm:$0xff] %v1448_v41  ;;  %v1443_v0 = vadd.f32 %v1419_v48, %v1315_v36  ;;  %v1410_v43 = vsel %vm1409_vm9, %v1407_v46, %v1404_v45 }
 0x621   :  { %v1442_v51 = vadd.f32 %v1410_v43, %v1314_v37  ;;  %v1425_v2 = vmul.f32 %v3176_v12, %v1424_v3 }
 0x622   :  { %v2542_v52 = vpop.eup %2541  ;;  %v1451_v53 = vsel %vm1323_vm10, %v3136_v10, %v1443_v0  ;;  %v1317_v10 = vmax.f32 %v3142_v21, 0.0 }
 0x623   :  { %1459 = vst [vmem:[%s3281_s23 + $0x8] sm:$0xff] %v1451_v53  ;;  %v1450_v54 = vsel %vm1322_vm11, %v3138_v13, %v1442_v51  ;;  %v1431_v55 = vmul.f32 0.6931472, %v2542_v52  ;;  %v2544_v60 = vpop.eup %2543  ;;  %v1316_v13 = vmax.f32 %v3144_v24, 0.0 }
 0x624   :  { %1458 = vst [vmem:[%s3281_s23] sm:$0xff] %v1450_v54  ;;  %v1422_v63 = vmul.f32 0.6931472, %v2544_v60 }
 0x625   :  { %v1437_v61 = vsel %vm1436_vm12, %v1434_v57, %v1431_v55 }
 0x626   :  { %v1445_v62 = vadd.f32 %v1437_v61, %v1317_v10  ;;  %v1428_v4 = vsel %vm1427_vm14, %v1425_v2, %v1422_v63 }
 0x627   :  { %v1444_v6 = vadd.f32 %v1428_v4, %v1316_v13 }
 0x628   :  { %v1453_v1 = vsel %vm1325_vm13, %v3142_v21, %v1445_v62 }
 0x629   :  { %1461 = vst [vmem:[%s3282_s24 + $0x8] sm:$0xff] %v1453_v1  ;;  %v1452_v7 = vsel %vm1324_vm15, %v3144_v24, %v1444_v6 }
 0x62a   :  { %1460 = vst [vmem:[%s3282_s24] sm:$0xff] %v1452_v7 }
 0x62b   :  { %1486 = vsyncpa [#allocation3], 1 }
 0x62c   :  { %1487 = vsyncpa [#allocation5], 1 }
 0x62d   :  { %1488 = vsyncpa [#allocation8], 1 }
 0x62e   :  { %1489 = vsyncpa [#allocation11], 1 }

</bundles_post_ra>
